<compile_context>
chip_gen: v7x
topology: tpu7x:2x2x1
jax: 0.10.0
libtpu: 0.0.40
codegen_flags: <defaults>
</compile_context>

<pallas_src>
import functools
import math

import jax
import jax.numpy as jnp
from jax.experimental import pallas as pl
from jax.experimental.pallas import tpu as pltpu


def _bilstm_layer_kernel(x_ref, wih_ref, whh_ref, b_ref, out_ref, gx_sc,
                         *, seq_len, batch):
    """One bidirectional LSTM layer; grid axis 0 is the direction (0=fwd,1=bwd).

    x_ref  : (NC, T*B, F)   layer input, NC chunks on the feature axis
                            (NC=1 for layer 0, NC=2 [fwd,bwd] for deeper layers)
    wih_ref: (1, NC, F, 4H) input->gate weights for this direction (bf16)
    whh_ref: (1, H, 4H)     hidden->gate weights for this direction (bf16)
    b_ref  : (1, 1, 4H)     combined bias b_ih + b_hh (f32)
    out_ref: (1, T*B, H)    hidden states for this direction (f32)
    gx_sc  : (T*B, 4H)      VMEM scratch: precomputed gate pre-activations
    """
    d = pl.program_id(0)                       # 0 = forward, 1 = backward
    nc = x_ref.shape[0]
    tb = x_ref.shape[1]
    hidden = whh_ref.shape[1]
    T, B, H = seq_len, batch, hidden

    # ---- Input projection for ALL timesteps (hoisted off the critical path).
    # One GEMM per input chunk with M = T*B; bf16 operands, f32 accumulation.
    gx = jnp.zeros((tb, 4 * H), jnp.float32)
    for k in range(nc):                        # static: 1 or 2 chunks
        gx = gx + jnp.dot(x_ref[k].astype(jnp.bfloat16), wih_ref[0, k],
                          preferred_element_type=jnp.float32)
    gx_sc[...] = gx + b_ref[0]                 # (T*B, 4H) + (1, 4H) bias

    whh = whh_ref[0]                           # (H, 4H) bf16, kept resident
    lane = jax.lax.broadcasted_iota(jnp.int32, (B, 4 * H), 1)
    g_sel = (lane >= 2 * H) & (lane < 3 * H)   # cell-candidate lanes -> tanh

    # ---- Sequential recurrence, fully unrolled in one grid step.
    def step(t, carry):
        h, c = carry                           # f32 (B, H), (B, H)
        idx = jnp.where(d == 0, t, T - 1 - t)  # time index for this direction
        row = idx * B                          # row offset in the (T*B, .) slab
        gates = gx_sc[pl.ds(row, B), :] + jnp.dot(
            h.astype(jnp.bfloat16), whh, preferred_element_type=jnp.float32)
        # Activate the full 128-lane tile once; tanh only on the g-gate lanes.
        act = jnp.where(g_sel, jnp.tanh(gates), jax.nn.sigmoid(gates))
        i_g = act[:, 0 * H:1 * H]
        f_g = act[:, 1 * H:2 * H]
        g_g = act[:, 2 * H:3 * H]
        o_g = act[:, 3 * H:4 * H]
        c_new = f_g * c + i_g * g_g
        h_new = o_g * jnp.tanh(c_new)
        out_ref[0, pl.ds(row, B), :] = h_new.astype(out_ref.dtype)
        return h_new, c_new

    h0 = jnp.zeros((B, H), jnp.float32)
    c0 = jnp.zeros((B, H), jnp.float32)
    jax.lax.fori_loop(0, T, step, (h0, c0), unroll=True)


def _bilstm_layer(x_split, wih_stack, whh_stack, bias_stack,
                  seq_len, batch, hidden_size):
    """Run one bidirectional layer. x_split: (NC, T*B, F) -> (2, T*B, H)."""
    nc, tb, feat = x_split.shape
    H = hidden_size
    kernel = functools.partial(_bilstm_layer_kernel,
                               seq_len=seq_len, batch=batch)
    # NOTE: at these sizes everything fits VMEM on every generation
    # (v7x's 64 MiB included); re-derive tiling only if T/H are scaled up.
    return pl.pallas_call(
        kernel,
        out_shape=jax.ShapeDtypeStruct((2, tb, H), jnp.float32),
        grid_spec=pltpu.PrefetchScalarGridSpec(
            num_scalar_prefetch=0,
            grid=(2,),                                     # direction axis
            in_specs=[
                pl.BlockSpec((nc, tb, feat), lambda d: (0, 0, 0)),
                pl.BlockSpec((1, nc, feat, 4 * H), lambda d: (d, 0, 0, 0)),
                pl.BlockSpec((1, H, 4 * H), lambda d: (d, 0, 0)),
                pl.BlockSpec((1, 1, 4 * H), lambda d: (d, 0, 0)),
            ],
            out_specs=pl.BlockSpec((1, tb, H), lambda d: (d, 0, 0)),
            scratch_shapes=[pltpu.VMEM((tb, 4 * H), jnp.float32)],
        ),
        compiler_params=pltpu.CompilerParams(
            # Direction axis is independent (each grid step re-initializes all
            # state) -> safe "parallel"; lets v7x run one direction per core.
            dimension_semantics=("parallel",)),
    )(x_split, wih_stack, whh_stack, bias_stack)


def bilstm_forward(x, params, hidden_size, num_layer):
    """x: (B, T, input_size) batch-first. Returns (B, T, 2*hidden_size)."""
    B, T, _ = x.shape
    H = hidden_size
    # Time-major, flattened rows: row t*B + b  <->  (t, b).
    x_tm = jnp.transpose(x, (1, 0, 2)).astype(jnp.float32)     # (T, B, I)
    layer_in = x_tm.reshape(1, T * B, x.shape[-1])             # (NC=1, T*B, I)

    for layer in range(num_layer):
        nc = layer_in.shape[0]
        feat = layer_in.shape[-1]
        wih, whh, bias = [], [], []
        for direction in range(2):
            w_ih, w_hh, b_ih, b_hh = params[(layer, direction)]
            # (4H, nc*feat) -> (nc, feat, 4H); chunk k multiplies input chunk k
            wih.append(jnp.transpose(w_ih.reshape(4 * H, nc, feat), (1, 2, 0)))
            whh.append(jnp.transpose(w_hh))                    # (H, 4H)
            bias.append((b_ih + b_hh).reshape(1, 4 * H))
        wih_stack = jnp.stack(wih).astype(jnp.bfloat16)        # (2, nc, F, 4H)
        whh_stack = jnp.stack(whh).astype(jnp.bfloat16)        # (2, H, 4H)
        bias_stack = jnp.stack(bias).astype(jnp.float32)       # (2, 1, 4H)

        layer_in = _bilstm_layer(layer_in, wih_stack, whh_stack, bias_stack,
                                 T, B, H)                      # (2, T*B, H)
        # TODO(synk): inter-layer dropout(p=0.5) is training-only; eval
        #             semantics (dropout disabled) are implemented here.

    # (2, T*B, H) -> (B, T, 2H) with features = [fwd, bwd] (PyTorch layout).
    out = layer_in.reshape(2, T, B, H)
    out = jnp.transpose(out, (2, 1, 0, 3)).reshape(B, T, 2 * H)
    return out


def init_bilstm_params(key, input_size, hidden_size, num_layer):
    """PyTorch nn.LSTM parameter shapes, uniform(-1/sqrt(H), 1/sqrt(H))."""
    params = {}
    bound = 1.0 / math.sqrt(hidden_size)
    for layer in range(num_layer):
        in_size = input_size if layer == 0 else 2 * hidden_size
        for direction in range(2):
            key, k1, k2, k3, k4 = jax.random.split(key, 5)
            w_ih = jax.random.uniform(k1, (4 * hidden_size, in_size),
                                      jnp.float32, -bound, bound)
            w_hh = jax.random.uniform(k2, (4 * hidden_size, hidden_size),
                                      jnp.float32, -bound, bound)
            b_ih = jax.random.uniform(k3, (4 * hidden_size,),
                                      jnp.float32, -bound, bound)
            b_hh = jax.random.uniform(k4, (4 * hidden_size,),
                                      jnp.float32, -bound, bound)
            params[(layer, direction)] = (w_ih, w_hh, b_ih, b_hh)
    return params


# ---------------- pure-JAX reference (for correctness check) ----------------
def _ref_lstm_direction(x_tm, w_ih, w_hh, b_ih, b_hh, hidden_size, reverse):
    T, B, _ = x_tm.shape
    H = hidden_size
    xs = x_tm[::-1] if reverse else x_tm

    def step(carry, x_t):
        h, c = carry
        gates = x_t @ w_ih.T + b_ih + h @ w_hh.T + b_hh
        i = jax.nn.sigmoid(gates[:, 0 * H:1 * H])
        f = jax.nn.sigmoid(gates[:, 1 * H:2 * H])
        g = jnp.tanh(gates[:, 2 * H:3 * H])
        o = jax.nn.sigmoid(gates[:, 3 * H:4 * H])
        c = f * c + i * g
        h = o * jnp.tanh(c)
        return (h, c), h

    h0 = jnp.zeros((B, H), jnp.float32)
    c0 = jnp.zeros((B, H), jnp.float32)
    _, hs = jax.lax.scan(step, (h0, c0), xs)
    return hs[::-1] if reverse else hs


def bilstm_reference(x, params, hidden_size, num_layer):
    x_tm = jnp.transpose(x, (1, 0, 2))
    for layer in range(num_layer):
        f = _ref_lstm_direction(x_tm, *params[(layer, 0)], hidden_size, False)
        b = _ref_lstm_direction(x_tm, *params[(layer, 1)], hidden_size, True)
        x_tm = jnp.concatenate([f, b], axis=-1)
    return jnp.transpose(x_tm, (1, 0, 2))


if __name__ == "__main__":
    B, T = 2, 8
    INPUT_SIZE, HIDDEN_SIZE, NUM_LAYER = 16, 32, 2

    key = jax.random.PRNGKey(0)
    key, kx = jax.random.split(key)
    x = jax.random.normal(kx, (B, T, INPUT_SIZE), jnp.float32)
    params = init_bilstm_params(key, INPUT_SIZE, HIDDEN_SIZE, NUM_LAYER)

    fwd = jax.jit(functools.partial(
        bilstm_forward, hidden_size=HIDDEN_SIZE, num_layer=NUM_LAYER))
    out = jax.block_until_ready(fwd(x, params))

    assert out.shape == (B, T, 2 * HIDDEN_SIZE), out.shape

    ref = bilstm_reference(x, params, HIDDEN_SIZE, NUM_LAYER)
    # bf16 MXU operands (f32 accumulation/state) vs. pure-f32 reference.
    max_err = float(jnp.max(jnp.abs(out - ref)))
    assert max_err < 5e-2, max_err

    print("KERNEL_OK")
</pallas_src>

<mosaic_0001>
module attributes {stable_mosaic.version = 11 : i64} {
  func.func @_bilstm_layer_kernel(%arg0: i32, %arg1: memref<1x16x16xf32, #tpu.memory_space<vmem>>, %arg2: memref<1x1x16x128xbf16, #tpu.memory_space<vmem>>, %arg3: memref<1x32x128xbf16, #tpu.memory_space<vmem>>, %arg4: memref<1x1x128xf32, #tpu.memory_space<vmem>>, %arg5: memref<1x16x32xf32, #tpu.memory_space<vmem>>, %arg6: memref<16x128xf32, #tpu.memory_space<vmem>>) attributes {dimension_semantics = [#tpu.dimension_semantics<parallel>], iteration_bounds = array<i64: 2>, scalar_prefetch = 0 : i64, scratch_operands = 1 : i64, tpu.core_type = #tpu.core_type<tc>, window_params = [{pipeline_mode = #tpu.pipeline_mode<synchronous>, transform_indices = @transform_0, window_bounds = array<i64: 1, 16, 16>}, {transform_indices = @transform_1, window_bounds = array<i64: 1, 1, 16, 128>}, {transform_indices = @transform_2, window_bounds = array<i64: 1, 32, 128>}, {transform_indices = @transform_3, window_bounds = array<i64: 1, 1, 128>}, {transform_indices = @transform_4, window_bounds = array<i64: 1, 16, 32>}]} {
    %cst = arith.constant 0.000000e+00 : f32
    %0 = vector.broadcast %cst : f32 to vector<16x128xf32>
    %c0 = arith.constant 0 : index
    %c0_0 = arith.constant 0 : index
    %c0_1 = arith.constant 0 : index
    %1 = vector.load %arg1[%c0, %c0_0, %c0_1] : memref<1x16x16xf32, #tpu.memory_space<vmem>>, vector<1x16x16xf32>
    %2 = vector.shape_cast %1 : vector<1x16x16xf32> to vector<16x16xf32>
    %3 = arith.truncf %2 : vector<16x16xf32> to vector<16x16xbf16>
    %c0_2 = arith.constant 0 : index
    %c0_3 = arith.constant 0 : index
    %c0_4 = arith.constant 0 : index
    %c0_5 = arith.constant 0 : index
    %4 = vector.load %arg2[%c0_2, %c0_3, %c0_4, %c0_5] : memref<1x1x16x128xbf16, #tpu.memory_space<vmem>>, vector<1x1x16x128xbf16>
    %5 = vector.shape_cast %4 : vector<1x1x16x128xbf16> to vector<16x128xbf16>
    %cst_6 = arith.constant dense<0.000000e+00> : vector<16x128xf32>
    %6 = tpu.matmul %3, %5, %cst_6 {dimension_numbers = #tpu.dot_dimension_numbers<[1], [0], [0], [1], [0, 0, 1, 1], [], []>} : vector<16x16xbf16>, vector<16x128xbf16>, vector<16x128xf32> -> vector<16x128xf32>
    %7 = arith.addf %0, %6 : vector<16x128xf32>
    %c0_7 = arith.constant 0 : index
    %c0_8 = arith.constant 0 : index
    %c0_9 = arith.constant 0 : index
    %8 = vector.load %arg4[%c0_7, %c0_8, %c0_9] : memref<1x1x128xf32, #tpu.memory_space<vmem>>, vector<1x1x128xf32>
    %9 = vector.shape_cast %8 : vector<1x1x128xf32> to vector<1x128xf32>
    %10 = vector.broadcast %9 : vector<1x128xf32> to vector<16x128xf32>
    %11 = arith.addf %7, %10 : vector<16x128xf32>
    %c0_10 = arith.constant 0 : index
    %c0_11 = arith.constant 0 : index
    %12 = vector.load %arg6[%c0_10, %c0_11] : memref<16x128xf32, #tpu.memory_space<vmem>>, vector<16x128xf32>
    tpu.vector_store %arg6[%c0_10, %c0_11], %11 {strides = array<i32>} : memref<16x128xf32, #tpu.memory_space<vmem>>, vector<16x128xf32>,
    %c0_12 = arith.constant 0 : index
    %c0_13 = arith.constant 0 : index
    %c0_14 = arith.constant 0 : index
    %13 = vector.load %arg3[%c0_12, %c0_13, %c0_14] : memref<1x32x128xbf16, #tpu.memory_space<vmem>>, vector<1x32x128xbf16>
    %14 = vector.shape_cast %13 : vector<1x32x128xbf16> to vector<32x128xbf16>
    %15 = tpu.iota {dimensions = array<i32: 1>} : vector<2x128xi32>
    %c64_i32 = arith.constant 64 : i32
    %16 = vector.broadcast %c64_i32 : i32 to vector<2x128xi32>
    %17 = arith.cmpi sge, %15, %16 : vector<2x128xi32>
    %c96_i32 = arith.constant 96 : i32
    %18 = vector.broadcast %c96_i32 : i32 to vector<2x128xi32>
    %19 = arith.cmpi slt, %15, %18 : vector<2x128xi32>
    %20 = arith.andi %17, %19 : vector<2x128xi1>
    %cst_15 = arith.constant 0.000000e+00 : f32
    %21 = vector.broadcast %cst_15 : f32 to vector<2x32xf32>
    %cst_16 = arith.constant 0.000000e+00 : f32
    %22 = vector.broadcast %cst_16 : f32 to vector<2x32xf32>
    %c0_i32 = arith.constant 0 : i32
    %c0_i32_17 = arith.constant 0 : i32
    %23 = arith.cmpi eq, %arg0, %c0_i32_17 : i32
    %c7_i32 = arith.constant 7 : i32
    %24 = arith.subi %c7_i32, %c0_i32 : i32
    %25 = arith.select %23, %c0_i32, %24 : i32
    %c2_i32 = arith.constant 2 : i32
    %26 = arith.muli %25, %c2_i32 : i32
    %27 = arith.index_cast %26 : i32 to index
    %c0_18 = arith.constant 0 : index
    %28 = vector.load %arg6[%27, %c0_18] : memref<16x128xf32, #tpu.memory_space<vmem>>, vector<2x128xf32>
    %29 = arith.truncf %21 : vector<2x32xf32> to vector<2x32xbf16>
    %cst_19 = arith.constant dense<0.000000e+00> : vector<2x128xf32>
    %30 = tpu.matmul %29, %14, %cst_19 {dimension_numbers = #tpu.dot_dimension_numbers<[1], [0], [0], [1], [0, 0, 1, 1], [], []>} : vector<2x32xbf16>, vector<32x128xbf16>, vector<2x128xf32> -> vector<2x128xf32>
    %31 = arith.addf %28, %30 : vector<2x128xf32>
    %32 = math.tanh %31 : vector<2x128xf32>
    %33 = arith.negf %31 : vector<2x128xf32>
    %34 = math.exp %33 : vector<2x128xf32>
    %cst_20 = arith.constant 1.000000e+00 : f32
    %35 = vector.broadcast %cst_20 : f32 to vector<2x128xf32>
    %36 = arith.addf %35, %34 : vector<2x128xf32>
    %37 = arith.divf %35, %36 : vector<2x128xf32>
    %38 = arith.select %20, %32, %37 : vector<2x128xi1>, vector<2x128xf32>
    %39 = vector.extract_strided_slice %38 {offsets = [0, 0], sizes = [2, 32], strides = [1, 1]} : vector<2x128xf32> to vector<2x32xf32>
    %40 = vector.extract_strided_slice %38 {offsets = [0, 32], sizes = [2, 32], strides = [1, 1]} : vector<2x128xf32> to vector<2x32xf32>
    %41 = vector.extract_strided_slice %38 {offsets = [0, 64], sizes = [2, 32], strides = [1, 1]} : vector<2x128xf32> to vector<2x32xf32>
    %42 = vector.extract_strided_slice %38 {offsets = [0, 96], sizes = [2, 32], strides = [1, 1]} : vector<2x128xf32> to vector<2x32xf32>
    %43 = arith.mulf %40, %22 : vector<2x32xf32>
    %44 = arith.mulf %39, %41 : vector<2x32xf32>
    %45 = arith.addf %43, %44 : vector<2x32xf32>
    %46 = math.tanh %45 : vector<2x32xf32>
    %47 = arith.mulf %42, %46 : vector<2x32xf32>
    %c0_21 = arith.constant 0 : index
    %48 = arith.index_cast %26 : i32 to index
    %c0_22 = arith.constant 0 : index
    %49 = vector.load %arg5[%c0_21, %48, %c0_22] : memref<1x16x32xf32, #tpu.memory_space<vmem>>, vector<1x2x32xf32>
    %50 = vector.shape_cast %49 : vector<1x2x32xf32> to vector<2x32xf32>
    %51 = vector.shape_cast %47 : vector<2x32xf32> to vector<1x2x32xf32>
    tpu.vector_store %arg5[%c0_21, %48, %c0_22], %51 {strides = array<i32>} : memref<1x16x32xf32, #tpu.memory_space<vmem>>, vector<1x2x32xf32>,
    %c1_i32 = arith.constant 1 : i32
    %c0_i32_23 = arith.constant 0 : i32
    %52 = arith.cmpi eq, %arg0, %c0_i32_23 : i32
    %c7_i32_24 = arith.constant 7 : i32
    %53 = arith.subi %c7_i32_24, %c1_i32 : i32
    %54 = arith.select %52, %c1_i32, %53 : i32
    %c2_i32_25 = arith.constant 2 : i32
    %55 = arith.muli %54, %c2_i32_25 : i32
    %56 = arith.index_cast %55 : i32 to index
    %c0_26 = arith.constant 0 : index
    %57 = vector.load %arg6[%56, %c0_26] : memref<16x128xf32, #tpu.memory_space<vmem>>, vector<2x128xf32>
    %58 = arith.truncf %47 : vector<2x32xf32> to vector<2x32xbf16>
    %cst_27 = arith.constant dense<0.000000e+00> : vector<2x128xf32>
    %59 = tpu.matmul %58, %14, %cst_27 {dimension_numbers = #tpu.dot_dimension_numbers<[1], [0], [0], [1], [0, 0, 1, 1], [], []>} : vector<2x32xbf16>, vector<32x128xbf16>, vector<2x128xf32> -> vector<2x128xf32>
    %60 = arith.addf %57, %59 : vector<2x128xf32>
    %61 = math.tanh %60 : vector<2x128xf32>
    %62 = arith.negf %60 : vector<2x128xf32>
    %63 = math.exp %62 : vector<2x128xf32>
    %cst_28 = arith.constant 1.000000e+00 : f32
    %64 = vector.broadcast %cst_28 : f32 to vector<2x128xf32>
    %65 = arith.addf %64, %63 : vector<2x128xf32>
    %66 = arith.divf %64, %65 : vector<2x128xf32>
    %67 = arith.select %20, %61, %66 : vector<2x128xi1>, vector<2x128xf32>
    %68 = vector.extract_strided_slice %67 {offsets = [0, 0], sizes = [2, 32], strides = [1, 1]} : vector<2x128xf32> to vector<2x32xf32>
    %69 = vector.extract_strided_slice %67 {offsets = [0, 32], sizes = [2, 32], strides = [1, 1]} : vector<2x128xf32> to vector<2x32xf32>
    %70 = vector.extract_strided_slice %67 {offsets = [0, 64], sizes = [2, 32], strides = [1, 1]} : vector<2x128xf32> to vector<2x32xf32>
    %71 = vector.extract_strided_slice %67 {offsets = [0, 96], sizes = [2, 32], strides = [1, 1]} : vector<2x128xf32> to vector<2x32xf32>
    %72 = arith.mulf %69, %45 : vector<2x32xf32>
    %73 = arith.mulf %68, %70 : vector<2x32xf32>
    %74 = arith.addf %72, %73 : vector<2x32xf32>
    %75 = math.tanh %74 : vector<2x32xf32>
    %76 = arith.mulf %71, %75 : vector<2x32xf32>
    %c0_29 = arith.constant 0 : index
    %77 = arith.index_cast %55 : i32 to index
    %c0_30 = arith.constant 0 : index
    %78 = vector.load %arg5[%c0_29, %77, %c0_30] : memref<1x16x32xf32, #tpu.memory_space<vmem>>, vector<1x2x32xf32>
    %79 = vector.shape_cast %78 : vector<1x2x32xf32> to vector<2x32xf32>
    %80 = vector.shape_cast %76 : vector<2x32xf32> to vector<1x2x32xf32>
    tpu.vector_store %arg5[%c0_29, %77, %c0_30], %80 {strides = array<i32>} : memref<1x16x32xf32, #tpu.memory_space<vmem>>, vector<1x2x32xf32>,
    %c2_i32_31 = arith.constant 2 : i32
    %c0_i32_32 = arith.constant 0 : i32
    %81 = arith.cmpi eq, %arg0, %c0_i32_32 : i32
    %c7_i32_33 = arith.constant 7 : i32
    %82 = arith.subi %c7_i32_33, %c2_i32_31 : i32
    %83 = arith.select %81, %c2_i32_31, %82 : i32
    %c2_i32_34 = arith.constant 2 : i32
    %84 = arith.muli %83, %c2_i32_34 : i32
    %85 = arith.index_cast %84 : i32 to index
    %c0_35 = arith.constant 0 : index
    %86 = vector.load %arg6[%85, %c0_35] : memref<16x128xf32, #tpu.memory_space<vmem>>, vector<2x128xf32>
    %87 = arith.truncf %76 : vector<2x32xf32> to vector<2x32xbf16>
    %cst_36 = arith.constant dense<0.000000e+00> : vector<2x128xf32>
    %88 = tpu.matmul %87, %14, %cst_36 {dimension_numbers = #tpu.dot_dimension_numbers<[1], [0], [0], [1], [0, 0, 1, 1], [], []>} : vector<2x32xbf16>, vector<32x128xbf16>, vector<2x128xf32> -> vector<2x128xf32>
    %89 = arith.addf %86, %88 : vector<2x128xf32>
    %90 = math.tanh %89 : vector<2x128xf32>
    %91 = arith.negf %89 : vector<2x128xf32>
    %92 = math.exp %91 : vector<2x128xf32>
    %cst_37 = arith.constant 1.000000e+00 : f32
    %93 = vector.broadcast %cst_37 : f32 to vector<2x128xf32>
    %94 = arith.addf %93, %92 : vector<2x128xf32>
    %95 = arith.divf %93, %94 : vector<2x128xf32>
    %96 = arith.select %20, %90, %95 : vector<2x128xi1>, vector<2x128xf32>
    %97 = vector.extract_strided_slice %96 {offsets = [0, 0], sizes = [2, 32], strides = [1, 1]} : vector<2x128xf32> to vector<2x32xf32>
    %98 = vector.extract_strided_slice %96 {offsets = [0, 32], sizes = [2, 32], strides = [1, 1]} : vector<2x128xf32> to vector<2x32xf32>
    %99 = vector.extract_strided_slice %96 {offsets = [0, 64], sizes = [2, 32], strides = [1, 1]} : vector<2x128xf32> to vector<2x32xf32>
    %100 = vector.extract_strided_slice %96 {offsets = [0, 96], sizes = [2, 32], strides = [1, 1]} : vector<2x128xf32> to vector<2x32xf32>
    %101 = arith.mulf %98, %74 : vector<2x32xf32>
    %102 = arith.mulf %97, %99 : vector<2x32xf32>
    %103 = arith.addf %101, %102 : vector<2x32xf32>
    %104 = math.tanh %103 : vector<2x32xf32>
    %105 = arith.mulf %100, %104 : vector<2x32xf32>
    %c0_38 = arith.constant 0 : index
    %106 = arith.index_cast %84 : i32 to index
    %c0_39 = arith.constant 0 : index
    %107 = vector.load %arg5[%c0_38, %106, %c0_39] : memref<1x16x32xf32, #tpu.memory_space<vmem>>, vector<1x2x32xf32>
    %108 = vector.shape_cast %107 : vector<1x2x32xf32> to vector<2x32xf32>
    %109 = vector.shape_cast %105 : vector<2x32xf32> to vector<1x2x32xf32>
    tpu.vector_store %arg5[%c0_38, %106, %c0_39], %109 {strides = array<i32>} : memref<1x16x32xf32, #tpu.memory_space<vmem>>, vector<1x2x32xf32>,
    %c3_i32 = arith.constant 3 : i32
    %c0_i32_40 = arith.constant 0 : i32
    %110 = arith.cmpi eq, %arg0, %c0_i32_40 : i32
    %c7_i32_41 = arith.constant 7 : i32
    %111 = arith.subi %c7_i32_41, %c3_i32 : i32
    %112 = arith.select %110, %c3_i32, %111 : i32
    %c2_i32_42 = arith.constant 2 : i32
    %113 = arith.muli %112, %c2_i32_42 : i32
    %114 = arith.index_cast %113 : i32 to index
    %c0_43 = arith.constant 0 : index
    %115 = vector.load %arg6[%114, %c0_43] : memref<16x128xf32, #tpu.memory_space<vmem>>, vector<2x128xf32>
    %116 = arith.truncf %105 : vector<2x32xf32> to vector<2x32xbf16>
    %cst_44 = arith.constant dense<0.000000e+00> : vector<2x128xf32>
    %117 = tpu.matmul %116, %14, %cst_44 {dimension_numbers = #tpu.dot_dimension_numbers<[1], [0], [0], [1], [0, 0, 1, 1], [], []>} : vector<2x32xbf16>, vector<32x128xbf16>, vector<2x128xf32> -> vector<2x128xf32>
    %118 = arith.addf %115, %117 : vector<2x128xf32>
    %119 = math.tanh %118 : vector<2x128xf32>
    %120 = arith.negf %118 : vector<2x128xf32>
    %121 = math.exp %120 : vector<2x128xf32>
    %cst_45 = arith.constant 1.000000e+00 : f32
    %122 = vector.broadcast %cst_45 : f32 to vector<2x128xf32>
    %123 = arith.addf %122, %121 : vector<2x128xf32>
    %124 = arith.divf %122, %123 : vector<2x128xf32>
    %125 = arith.select %20, %119, %124 : vector<2x128xi1>, vector<2x128xf32>
    %126 = vector.extract_strided_slice %125 {offsets = [0, 0], sizes = [2, 32], strides = [1, 1]} : vector<2x128xf32> to vector<2x32xf32>
    %127 = vector.extract_strided_slice %125 {offsets = [0, 32], sizes = [2, 32], strides = [1, 1]} : vector<2x128xf32> to vector<2x32xf32>
    %128 = vector.extract_strided_slice %125 {offsets = [0, 64], sizes = [2, 32], strides = [1, 1]} : vector<2x128xf32> to vector<2x32xf32>
    %129 = vector.extract_strided_slice %125 {offsets = [0, 96], sizes = [2, 32], strides = [1, 1]} : vector<2x128xf32> to vector<2x32xf32>
    %130 = arith.mulf %127, %103 : vector<2x32xf32>
    %131 = arith.mulf %126, %128 : vector<2x32xf32>
    %132 = arith.addf %130, %131 : vector<2x32xf32>
    %133 = math.tanh %132 : vector<2x32xf32>
    %134 = arith.mulf %129, %133 : vector<2x32xf32>
    %c0_46 = arith.constant 0 : index
    %135 = arith.index_cast %113 : i32 to index
    %c0_47 = arith.constant 0 : index
    %136 = vector.load %arg5[%c0_46, %135, %c0_47] : memref<1x16x32xf32, #tpu.memory_space<vmem>>, vector<1x2x32xf32>
    %137 = vector.shape_cast %136 : vector<1x2x32xf32> to vector<2x32xf32>
    %138 = vector.shape_cast %134 : vector<2x32xf32> to vector<1x2x32xf32>
    tpu.vector_store %arg5[%c0_46, %135, %c0_47], %138 {strides = array<i32>} : memref<1x16x32xf32, #tpu.memory_space<vmem>>, vector<1x2x32xf32>,
    %c4_i32 = arith.constant 4 : i32
    %c0_i32_48 = arith.constant 0 : i32
    %139 = arith.cmpi eq, %arg0, %c0_i32_48 : i32
    %c7_i32_49 = arith.constant 7 : i32
    %140 = arith.subi %c7_i32_49, %c4_i32 : i32
    %141 = arith.select %139, %c4_i32, %140 : i32
    %c2_i32_50 = arith.constant 2 : i32
    %142 = arith.muli %141, %c2_i32_50 : i32
    %143 = arith.index_cast %142 : i32 to index
    %c0_51 = arith.constant 0 : index
    %144 = vector.load %arg6[%143, %c0_51] : memref<16x128xf32, #tpu.memory_space<vmem>>, vector<2x128xf32>
    %145 = arith.truncf %134 : vector<2x32xf32> to vector<2x32xbf16>
    %cst_52 = arith.constant dense<0.000000e+00> : vector<2x128xf32>
    %146 = tpu.matmul %145, %14, %cst_52 {dimension_numbers = #tpu.dot_dimension_numbers<[1], [0], [0], [1], [0, 0, 1, 1], [], []>} : vector<2x32xbf16>, vector<32x128xbf16>, vector<2x128xf32> -> vector<2x128xf32>
    %147 = arith.addf %144, %146 : vector<2x128xf32>
    %148 = math.tanh %147 : vector<2x128xf32>
    %149 = arith.negf %147 : vector<2x128xf32>
    %150 = math.exp %149 : vector<2x128xf32>
    %cst_53 = arith.constant 1.000000e+00 : f32
    %151 = vector.broadcast %cst_53 : f32 to vector<2x128xf32>
    %152 = arith.addf %151, %150 : vector<2x128xf32>
    %153 = arith.divf %151, %152 : vector<2x128xf32>
    %154 = arith.select %20, %148, %153 : vector<2x128xi1>, vector<2x128xf32>
    %155 = vector.extract_strided_slice %154 {offsets = [0, 0], sizes = [2, 32], strides = [1, 1]} : vector<2x128xf32> to vector<2x32xf32>
    %156 = vector.extract_strided_slice %154 {offsets = [0, 32], sizes = [2, 32], strides = [1, 1]} : vector<2x128xf32> to vector<2x32xf32>
    %157 = vector.extract_strided_slice %154 {offsets = [0, 64], sizes = [2, 32], strides = [1, 1]} : vector<2x128xf32> to vector<2x32xf32>
    %158 = vector.extract_strided_slice %154 {offsets = [0, 96], sizes = [2, 32], strides = [1, 1]} : vector<2x128xf32> to vector<2x32xf32>
    %159 = arith.mulf %156, %132 : vector<2x32xf32>
    %160 = arith.mulf %155, %157 : vector<2x32xf32>
    %161 = arith.addf %159, %160 : vector<2x32xf32>
    %162 = math.tanh %161 : vector<2x32xf32>
    %163 = arith.mulf %158, %162 : vector<2x32xf32>
    %c0_54 = arith.constant 0 : index
    %164 = arith.index_cast %142 : i32 to index
    %c0_55 = arith.constant 0 : index
    %165 = vector.load %arg5[%c0_54, %164, %c0_55] : memref<1x16x32xf32, #tpu.memory_space<vmem>>, vector<1x2x32xf32>
    %166 = vector.shape_cast %165 : vector<1x2x32xf32> to vector<2x32xf32>
    %167 = vector.shape_cast %163 : vector<2x32xf32> to vector<1x2x32xf32>
    tpu.vector_store %arg5[%c0_54, %164, %c0_55], %167 {strides = array<i32>} : memref<1x16x32xf32, #tpu.memory_space<vmem>>, vector<1x2x32xf32>,
    %c5_i32 = arith.constant 5 : i32
    %c0_i32_56 = arith.constant 0 : i32
    %168 = arith.cmpi eq, %arg0, %c0_i32_56 : i32
    %c7_i32_57 = arith.constant 7 : i32
    %169 = arith.subi %c7_i32_57, %c5_i32 : i32
    %170 = arith.select %168, %c5_i32, %169 : i32
    %c2_i32_58 = arith.constant 2 : i32
    %171 = arith.muli %170, %c2_i32_58 : i32
    %172 = arith.index_cast %171 : i32 to index
    %c0_59 = arith.constant 0 : index
    %173 = vector.load %arg6[%172, %c0_59] : memref<16x128xf32, #tpu.memory_space<vmem>>, vector<2x128xf32>
    %174 = arith.truncf %163 : vector<2x32xf32> to vector<2x32xbf16>
    %cst_60 = arith.constant dense<0.000000e+00> : vector<2x128xf32>
    %175 = tpu.matmul %174, %14, %cst_60 {dimension_numbers = #tpu.dot_dimension_numbers<[1], [0], [0], [1], [0, 0, 1, 1], [], []>} : vector<2x32xbf16>, vector<32x128xbf16>, vector<2x128xf32> -> vector<2x128xf32>
    %176 = arith.addf %173, %175 : vector<2x128xf32>
    %177 = math.tanh %176 : vector<2x128xf32>
    %178 = arith.negf %176 : vector<2x128xf32>
    %179 = math.exp %178 : vector<2x128xf32>
    %cst_61 = arith.constant 1.000000e+00 : f32
    %180 = vector.broadcast %cst_61 : f32 to vector<2x128xf32>
    %181 = arith.addf %180, %179 : vector<2x128xf32>
    %182 = arith.divf %180, %181 : vector<2x128xf32>
    %183 = arith.select %20, %177, %182 : vector<2x128xi1>, vector<2x128xf32>
    %184 = vector.extract_strided_slice %183 {offsets = [0, 0], sizes = [2, 32], strides = [1, 1]} : vector<2x128xf32> to vector<2x32xf32>
    %185 = vector.extract_strided_slice %183 {offsets = [0, 32], sizes = [2, 32], strides = [1, 1]} : vector<2x128xf32> to vector<2x32xf32>
    %186 = vector.extract_strided_slice %183 {offsets = [0, 64], sizes = [2, 32], strides = [1, 1]} : vector<2x128xf32> to vector<2x32xf32>
    %187 = vector.extract_strided_slice %183 {offsets = [0, 96], sizes = [2, 32], strides = [1, 1]} : vector<2x128xf32> to vector<2x32xf32>
    %188 = arith.mulf %185, %161 : vector<2x32xf32>
    %189 = arith.mulf %184, %186 : vector<2x32xf32>
    %190 = arith.addf %188, %189 : vector<2x32xf32>
    %191 = math.tanh %190 : vector<2x32xf32>
    %192 = arith.mulf %187, %191 : vector<2x32xf32>
    %c0_62 = arith.constant 0 : index
    %193 = arith.index_cast %171 : i32 to index
    %c0_63 = arith.constant 0 : index
    %194 = vector.load %arg5[%c0_62, %193, %c0_63] : memref<1x16x32xf32, #tpu.memory_space<vmem>>, vector<1x2x32xf32>
    %195 = vector.shape_cast %194 : vector<1x2x32xf32> to vector<2x32xf32>
    %196 = vector.shape_cast %192 : vector<2x32xf32> to vector<1x2x32xf32>
    tpu.vector_store %arg5[%c0_62, %193, %c0_63], %196 {strides = array<i32>} : memref<1x16x32xf32, #tpu.memory_space<vmem>>, vector<1x2x32xf32>,
    %c6_i32 = arith.constant 6 : i32
    %c0_i32_64 = arith.constant 0 : i32
    %197 = arith.cmpi eq, %arg0, %c0_i32_64 : i32
    %c7_i32_65 = arith.constant 7 : i32
    %198 = arith.subi %c7_i32_65, %c6_i32 : i32
    %199 = arith.select %197, %c6_i32, %198 : i32
    %c2_i32_66 = arith.constant 2 : i32
    %200 = arith.muli %199, %c2_i32_66 : i32
    %201 = arith.index_cast %200 : i32 to index
    %c0_67 = arith.constant 0 : index
    %202 = vector.load %arg6[%201, %c0_67] : memref<16x128xf32, #tpu.memory_space<vmem>>, vector<2x128xf32>
    %203 = arith.truncf %192 : vector<2x32xf32> to vector<2x32xbf16>
    %cst_68 = arith.constant dense<0.000000e+00> : vector<2x128xf32>
    %204 = tpu.matmul %203, %14, %cst_68 {dimension_numbers = #tpu.dot_dimension_numbers<[1], [0], [0], [1], [0, 0, 1, 1], [], []>} : vector<2x32xbf16>, vector<32x128xbf16>, vector<2x128xf32> -> vector<2x128xf32>
    %205 = arith.addf %202, %204 : vector<2x128xf32>
    %206 = math.tanh %205 : vector<2x128xf32>
    %207 = arith.negf %205 : vector<2x128xf32>
    %208 = math.exp %207 : vector<2x128xf32>
    %cst_69 = arith.constant 1.000000e+00 : f32
    %209 = vector.broadcast %cst_69 : f32 to vector<2x128xf32>
    %210 = arith.addf %209, %208 : vector<2x128xf32>
    %211 = arith.divf %209, %210 : vector<2x128xf32>
    %212 = arith.select %20, %206, %211 : vector<2x128xi1>, vector<2x128xf32>
    %213 = vector.extract_strided_slice %212 {offsets = [0, 0], sizes = [2, 32], strides = [1, 1]} : vector<2x128xf32> to vector<2x32xf32>
    %214 = vector.extract_strided_slice %212 {offsets = [0, 32], sizes = [2, 32], strides = [1, 1]} : vector<2x128xf32> to vector<2x32xf32>
    %215 = vector.extract_strided_slice %212 {offsets = [0, 64], sizes = [2, 32], strides = [1, 1]} : vector<2x128xf32> to vector<2x32xf32>
    %216 = vector.extract_strided_slice %212 {offsets = [0, 96], sizes = [2, 32], strides = [1, 1]} : vector<2x128xf32> to vector<2x32xf32>
    %217 = arith.mulf %214, %190 : vector<2x32xf32>
    %218 = arith.mulf %213, %215 : vector<2x32xf32>
    %219 = arith.addf %217, %218 : vector<2x32xf32>
    %220 = math.tanh %219 : vector<2x32xf32>
    %221 = arith.mulf %216, %220 : vector<2x32xf32>
    %c0_70 = arith.constant 0 : index
    %222 = arith.index_cast %200 : i32 to index
    %c0_71 = arith.constant 0 : index
    %223 = vector.load %arg5[%c0_70, %222, %c0_71] : memref<1x16x32xf32, #tpu.memory_space<vmem>>, vector<1x2x32xf32>
    %224 = vector.shape_cast %223 : vector<1x2x32xf32> to vector<2x32xf32>
    %225 = vector.shape_cast %221 : vector<2x32xf32> to vector<1x2x32xf32>
    tpu.vector_store %arg5[%c0_70, %222, %c0_71], %225 {strides = array<i32>} : memref<1x16x32xf32, #tpu.memory_space<vmem>>, vector<1x2x32xf32>,
    %c7_i32_72 = arith.constant 7 : i32
    %c0_i32_73 = arith.constant 0 : i32
    %226 = arith.cmpi eq, %arg0, %c0_i32_73 : i32
    %c7_i32_74 = arith.constant 7 : i32
    %227 = arith.subi %c7_i32_74, %c7_i32_72 : i32
    %228 = arith.select %226, %c7_i32_72, %227 : i32
    %c2_i32_75 = arith.constant 2 : i32
    %229 = arith.muli %228, %c2_i32_75 : i32
    %230 = arith.index_cast %229 : i32 to index
    %c0_76 = arith.constant 0 : index
    %231 = vector.load %arg6[%230, %c0_76] : memref<16x128xf32, #tpu.memory_space<vmem>>, vector<2x128xf32>
    %232 = arith.truncf %221 : vector<2x32xf32> to vector<2x32xbf16>
    %cst_77 = arith.constant dense<0.000000e+00> : vector<2x128xf32>
    %233 = tpu.matmul %232, %14, %cst_77 {dimension_numbers = #tpu.dot_dimension_numbers<[1], [0], [0], [1], [0, 0, 1, 1], [], []>} : vector<2x32xbf16>, vector<32x128xbf16>, vector<2x128xf32> -> vector<2x128xf32>
    %234 = arith.addf %231, %233 : vector<2x128xf32>
    %235 = math.tanh %234 : vector<2x128xf32>
    %236 = arith.negf %234 : vector<2x128xf32>
    %237 = math.exp %236 : vector<2x128xf32>
    %cst_78 = arith.constant 1.000000e+00 : f32
    %238 = vector.broadcast %cst_78 : f32 to vector<2x128xf32>
    %239 = arith.addf %238, %237 : vector<2x128xf32>
    %240 = arith.divf %238, %239 : vector<2x128xf32>
    %241 = arith.select %20, %235, %240 : vector<2x128xi1>, vector<2x128xf32>
    %242 = vector.extract_strided_slice %241 {offsets = [0, 0], sizes = [2, 32], strides = [1, 1]} : vector<2x128xf32> to vector<2x32xf32>
    %243 = vector.extract_strided_slice %241 {offsets = [0, 32], sizes = [2, 32], strides = [1, 1]} : vector<2x128xf32> to vector<2x32xf32>
    %244 = vector.extract_strided_slice %241 {offsets = [0, 64], sizes = [2, 32], strides = [1, 1]} : vector<2x128xf32> to vector<2x32xf32>
    %245 = vector.extract_strided_slice %241 {offsets = [0, 96], sizes = [2, 32], strides = [1, 1]} : vector<2x128xf32> to vector<2x32xf32>
    %246 = arith.mulf %243, %219 : vector<2x32xf32>
    %247 = arith.mulf %242, %244 : vector<2x32xf32>
    %248 = arith.addf %246, %247 : vector<2x32xf32>
    %249 = math.tanh %248 : vector<2x32xf32>
    %250 = arith.mulf %245, %249 : vector<2x32xf32>
    %c0_79 = arith.constant 0 : index
    %251 = arith.index_cast %229 : i32 to index
    %c0_80 = arith.constant 0 : index
    %252 = vector.load %arg5[%c0_79, %251, %c0_80] : memref<1x16x32xf32, #tpu.memory_space<vmem>>, vector<1x2x32xf32>
    %253 = vector.shape_cast %252 : vector<1x2x32xf32> to vector<2x32xf32>
    %254 = vector.shape_cast %250 : vector<2x32xf32> to vector<1x2x32xf32>
    tpu.vector_store %arg5[%c0_79, %251, %c0_80], %254 {strides = array<i32>} : memref<1x16x32xf32, #tpu.memory_space<vmem>>, vector<1x2x32xf32>,
    %c8_i32 = arith.constant 8 : i32
    return
  }
  func.func @transform_0(%arg0: i32) -> (i32, i32, i32) {
    %c0_i32 = arith.constant 0 : i32
    %c0_i32_0 = arith.constant 0 : i32
    %c0_i32_1 = arith.constant 0 : i32
    %c0_i32_2 = arith.constant 0 : i32
    return %c0_i32, %c0_i32_0, %c0_i32_1 : i32, i32, i32
  }
  func.func @transform_1(%arg0: i32) -> (i32, i32, i32, i32) {
    %c0_i32 = arith.constant 0 : i32
    %c0_i32_0 = arith.constant 0 : i32
    %c0_i32_1 = arith.constant 0 : i32
    %c0_i32_2 = arith.constant 0 : i32
    return %arg0, %c0_i32, %c0_i32_0, %c0_i32_1 : i32, i32, i32, i32
  }
  func.func @transform_2(%arg0: i32) -> (i32, i32, i32) {
    %c0_i32 = arith.constant 0 : i32
    %c0_i32_0 = arith.constant 0 : i32
    %c0_i32_1 = arith.constant 0 : i32
    return %arg0, %c0_i32, %c0_i32_0 : i32, i32, i32
  }
  func.func @transform_3(%arg0: i32) -> (i32, i32, i32) {
    %c0_i32 = arith.constant 0 : i32
    %c0_i32_0 = arith.constant 0 : i32
    %c0_i32_1 = arith.constant 0 : i32
    return %arg0, %c0_i32, %c0_i32_0 : i32, i32, i32
  }
  func.func @transform_4(%arg0: i32) -> (i32, i32, i32) {
    %c0_i32 = arith.constant 0 : i32
    %c0_i32_0 = arith.constant 0 : i32
    %c0_i32_1 = arith.constant 0 : i32
    return %arg0, %c0_i32, %c0_i32_0 : i32, i32, i32
  }
}

module attributes {stable_mosaic.version = 11 : i64} {
  func.func @_bilstm_layer_kernel(%arg0: i32, %arg1: memref<2x16x32xf32, #tpu.memory_space<vmem>>, %arg2: memref<1x2x32x128xbf16, #tpu.memory_space<vmem>>, %arg3: memref<1x32x128xbf16, #tpu.memory_space<vmem>>, %arg4: memref<1x1x128xf32, #tpu.memory_space<vmem>>, %arg5: memref<1x16x32xf32, #tpu.memory_space<vmem>>, %arg6: memref<16x128xf32, #tpu.memory_space<vmem>>) attributes {dimension_semantics = [#tpu.dimension_semantics<parallel>], iteration_bounds = array<i64: 2>, scalar_prefetch = 0 : i64, scratch_operands = 1 : i64, tpu.core_type = #tpu.core_type<tc>, window_params = [{pipeline_mode = #tpu.pipeline_mode<synchronous>, transform_indices = @transform_0, window_bounds = array<i64: 2, 16, 32>}, {transform_indices = @transform_1, window_bounds = array<i64: 1, 2, 32, 128>}, {transform_indices = @transform_2, window_bounds = array<i64: 1, 32, 128>}, {transform_indices = @transform_3, window_bounds = array<i64: 1, 1, 128>}, {transform_indices = @transform_4, window_bounds = array<i64: 1, 16, 32>}]} {
    %cst = arith.constant 0.000000e+00 : f32
    %0 = vector.broadcast %cst : f32 to vector<16x128xf32>
    %c0 = arith.constant 0 : index
    %c0_0 = arith.constant 0 : index
    %c0_1 = arith.constant 0 : index
    %1 = vector.load %arg1[%c0, %c0_0, %c0_1] : memref<2x16x32xf32, #tpu.memory_space<vmem>>, vector<1x16x32xf32>
    %2 = vector.shape_cast %1 : vector<1x16x32xf32> to vector<16x32xf32>
    %3 = arith.truncf %2 : vector<16x32xf32> to vector<16x32xbf16>
    %c0_2 = arith.constant 0 : index
    %c0_3 = arith.constant 0 : index
    %c0_4 = arith.constant 0 : index
    %c0_5 = arith.constant 0 : index
    %4 = vector.load %arg2[%c0_2, %c0_3, %c0_4, %c0_5] : memref<1x2x32x128xbf16, #tpu.memory_space<vmem>>, vector<1x1x32x128xbf16>
    %5 = vector.shape_cast %4 : vector<1x1x32x128xbf16> to vector<32x128xbf16>
    %cst_6 = arith.constant dense<0.000000e+00> : vector<16x128xf32>
    %6 = tpu.matmul %3, %5, %cst_6 {dimension_numbers = #tpu.dot_dimension_numbers<[1], [0], [0], [1], [0, 0, 1, 1], [], []>} : vector<16x32xbf16>, vector<32x128xbf16>, vector<16x128xf32> -> vector<16x128xf32>
    %7 = arith.addf %0, %6 : vector<16x128xf32>
    %c1 = arith.constant 1 : index
    %c0_7 = arith.constant 0 : index
    %c0_8 = arith.constant 0 : index
    %8 = vector.load %arg1[%c1, %c0_7, %c0_8] : memref<2x16x32xf32, #tpu.memory_space<vmem>>, vector<1x16x32xf32>
    %9 = vector.shape_cast %8 : vector<1x16x32xf32> to vector<16x32xf32>
    %10 = arith.truncf %9 : vector<16x32xf32> to vector<16x32xbf16>
    %c0_9 = arith.constant 0 : index
    %c1_10 = arith.constant 1 : index
    %c0_11 = arith.constant 0 : index
    %c0_12 = arith.constant 0 : index
    %11 = vector.load %arg2[%c0_9, %c1_10, %c0_11, %c0_12] : memref<1x2x32x128xbf16, #tpu.memory_space<vmem>>, vector<1x1x32x128xbf16>
    %12 = vector.shape_cast %11 : vector<1x1x32x128xbf16> to vector<32x128xbf16>
    %cst_13 = arith.constant dense<0.000000e+00> : vector<16x128xf32>
    %13 = tpu.matmul %10, %12, %cst_13 {dimension_numbers = #tpu.dot_dimension_numbers<[1], [0], [0], [1], [0, 0, 1, 1], [], []>} : vector<16x32xbf16>, vector<32x128xbf16>, vector<16x128xf32> -> vector<16x128xf32>
    %14 = arith.addf %7, %13 : vector<16x128xf32>
    %c0_14 = arith.constant 0 : index
    %c0_15 = arith.constant 0 : index
    %c0_16 = arith.constant 0 : index
    %15 = vector.load %arg4[%c0_14, %c0_15, %c0_16] : memref<1x1x128xf32, #tpu.memory_space<vmem>>, vector<1x1x128xf32>
    %16 = vector.shape_cast %15 : vector<1x1x128xf32> to vector<1x128xf32>
    %17 = vector.broadcast %16 : vector<1x128xf32> to vector<16x128xf32>
    %18 = arith.addf %14, %17 : vector<16x128xf32>
    %c0_17 = arith.constant 0 : index
    %c0_18 = arith.constant 0 : index
    %19 = vector.load %arg6[%c0_17, %c0_18] : memref<16x128xf32, #tpu.memory_space<vmem>>, vector<16x128xf32>
    tpu.vector_store %arg6[%c0_17, %c0_18], %18 {strides = array<i32>} : memref<16x128xf32, #tpu.memory_space<vmem>>, vector<16x128xf32>,
    %c0_19 = arith.constant 0 : index
    %c0_20 = arith.constant 0 : index
    %c0_21 = arith.constant 0 : index
    %20 = vector.load %arg3[%c0_19, %c0_20, %c0_21] : memref<1x32x128xbf16, #tpu.memory_space<vmem>>, vector<1x32x128xbf16>
    %21 = vector.shape_cast %20 : vector<1x32x128xbf16> to vector<32x128xbf16>
    %22 = tpu.iota {dimensions = array<i32: 1>} : vector<2x128xi32>
    %c64_i32 = arith.constant 64 : i32
    %23 = vector.broadcast %c64_i32 : i32 to vector<2x128xi32>
    %24 = arith.cmpi sge, %22, %23 : vector<2x128xi32>
    %c96_i32 = arith.constant 96 : i32
    %25 = vector.broadcast %c96_i32 : i32 to vector<2x128xi32>
    %26 = arith.cmpi slt, %22, %25 : vector<2x128xi32>
    %27 = arith.andi %24, %26 : vector<2x128xi1>
    %cst_22 = arith.constant 0.000000e+00 : f32
    %28 = vector.broadcast %cst_22 : f32 to vector<2x32xf32>
    %cst_23 = arith.constant 0.000000e+00 : f32
    %29 = vector.broadcast %cst_23 : f32 to vector<2x32xf32>
    %c0_i32 = arith.constant 0 : i32
    %c0_i32_24 = arith.constant 0 : i32
    %30 = arith.cmpi eq, %arg0, %c0_i32_24 : i32
    %c7_i32 = arith.constant 7 : i32
    %31 = arith.subi %c7_i32, %c0_i32 : i32
    %32 = arith.select %30, %c0_i32, %31 : i32
    %c2_i32 = arith.constant 2 : i32
    %33 = arith.muli %32, %c2_i32 : i32
    %34 = arith.index_cast %33 : i32 to index
    %c0_25 = arith.constant 0 : index
    %35 = vector.load %arg6[%34, %c0_25] : memref<16x128xf32, #tpu.memory_space<vmem>>, vector<2x128xf32>
    %36 = arith.truncf %28 : vector<2x32xf32> to vector<2x32xbf16>
    %cst_26 = arith.constant dense<0.000000e+00> : vector<2x128xf32>
    %37 = tpu.matmul %36, %21, %cst_26 {dimension_numbers = #tpu.dot_dimension_numbers<[1], [0], [0], [1], [0, 0, 1, 1], [], []>} : vector<2x32xbf16>, vector<32x128xbf16>, vector<2x128xf32> -> vector<2x128xf32>
    %38 = arith.addf %35, %37 : vector<2x128xf32>
    %39 = math.tanh %38 : vector<2x128xf32>
    %40 = arith.negf %38 : vector<2x128xf32>
    %41 = math.exp %40 : vector<2x128xf32>
    %cst_27 = arith.constant 1.000000e+00 : f32
    %42 = vector.broadcast %cst_27 : f32 to vector<2x128xf32>
    %43 = arith.addf %42, %41 : vector<2x128xf32>
    %44 = arith.divf %42, %43 : vector<2x128xf32>
    %45 = arith.select %27, %39, %44 : vector<2x128xi1>, vector<2x128xf32>
    %46 = vector.extract_strided_slice %45 {offsets = [0, 0], sizes = [2, 32], strides = [1, 1]} : vector<2x128xf32> to vector<2x32xf32>
    %47 = vector.extract_strided_slice %45 {offsets = [0, 32], sizes = [2, 32], strides = [1, 1]} : vector<2x128xf32> to vector<2x32xf32>
    %48 = vector.extract_strided_slice %45 {offsets = [0, 64], sizes = [2, 32], strides = [1, 1]} : vector<2x128xf32> to vector<2x32xf32>
    %49 = vector.extract_strided_slice %45 {offsets = [0, 96], sizes = [2, 32], strides = [1, 1]} : vector<2x128xf32> to vector<2x32xf32>
    %50 = arith.mulf %47, %29 : vector<2x32xf32>
    %51 = arith.mulf %46, %48 : vector<2x32xf32>
    %52 = arith.addf %50, %51 : vector<2x32xf32>
    %53 = math.tanh %52 : vector<2x32xf32>
    %54 = arith.mulf %49, %53 : vector<2x32xf32>
    %c0_28 = arith.constant 0 : index
    %55 = arith.index_cast %33 : i32 to index
    %c0_29 = arith.constant 0 : index
    %56 = vector.load %arg5[%c0_28, %55, %c0_29] : memref<1x16x32xf32, #tpu.memory_space<vmem>>, vector<1x2x32xf32>
    %57 = vector.shape_cast %56 : vector<1x2x32xf32> to vector<2x32xf32>
    %58 = vector.shape_cast %54 : vector<2x32xf32> to vector<1x2x32xf32>
    tpu.vector_store %arg5[%c0_28, %55, %c0_29], %58 {strides = array<i32>} : memref<1x16x32xf32, #tpu.memory_space<vmem>>, vector<1x2x32xf32>,
    %c1_i32 = arith.constant 1 : i32
    %c0_i32_30 = arith.constant 0 : i32
    %59 = arith.cmpi eq, %arg0, %c0_i32_30 : i32
    %c7_i32_31 = arith.constant 7 : i32
    %60 = arith.subi %c7_i32_31, %c1_i32 : i32
    %61 = arith.select %59, %c1_i32, %60 : i32
    %c2_i32_32 = arith.constant 2 : i32
    %62 = arith.muli %61, %c2_i32_32 : i32
    %63 = arith.index_cast %62 : i32 to index
    %c0_33 = arith.constant 0 : index
    %64 = vector.load %arg6[%63, %c0_33] : memref<16x128xf32, #tpu.memory_space<vmem>>, vector<2x128xf32>
    %65 = arith.truncf %54 : vector<2x32xf32> to vector<2x32xbf16>
    %cst_34 = arith.constant dense<0.000000e+00> : vector<2x128xf32>
    %66 = tpu.matmul %65, %21, %cst_34 {dimension_numbers = #tpu.dot_dimension_numbers<[1], [0], [0], [1], [0, 0, 1, 1], [], []>} : vector<2x32xbf16>, vector<32x128xbf16>, vector<2x128xf32> -> vector<2x128xf32>
    %67 = arith.addf %64, %66 : vector<2x128xf32>
    %68 = math.tanh %67 : vector<2x128xf32>
    %69 = arith.negf %67 : vector<2x128xf32>
    %70 = math.exp %69 : vector<2x128xf32>
    %cst_35 = arith.constant 1.000000e+00 : f32
    %71 = vector.broadcast %cst_35 : f32 to vector<2x128xf32>
    %72 = arith.addf %71, %70 : vector<2x128xf32>
    %73 = arith.divf %71, %72 : vector<2x128xf32>
    %74 = arith.select %27, %68, %73 : vector<2x128xi1>, vector<2x128xf32>
    %75 = vector.extract_strided_slice %74 {offsets = [0, 0], sizes = [2, 32], strides = [1, 1]} : vector<2x128xf32> to vector<2x32xf32>
    %76 = vector.extract_strided_slice %74 {offsets = [0, 32], sizes = [2, 32], strides = [1, 1]} : vector<2x128xf32> to vector<2x32xf32>
    %77 = vector.extract_strided_slice %74 {offsets = [0, 64], sizes = [2, 32], strides = [1, 1]} : vector<2x128xf32> to vector<2x32xf32>
    %78 = vector.extract_strided_slice %74 {offsets = [0, 96], sizes = [2, 32], strides = [1, 1]} : vector<2x128xf32> to vector<2x32xf32>
    %79 = arith.mulf %76, %52 : vector<2x32xf32>
    %80 = arith.mulf %75, %77 : vector<2x32xf32>
    %81 = arith.addf %79, %80 : vector<2x32xf32>
    %82 = math.tanh %81 : vector<2x32xf32>
    %83 = arith.mulf %78, %82 : vector<2x32xf32>
    %c0_36 = arith.constant 0 : index
    %84 = arith.index_cast %62 : i32 to index
    %c0_37 = arith.constant 0 : index
    %85 = vector.load %arg5[%c0_36, %84, %c0_37] : memref<1x16x32xf32, #tpu.memory_space<vmem>>, vector<1x2x32xf32>
    %86 = vector.shape_cast %85 : vector<1x2x32xf32> to vector<2x32xf32>
    %87 = vector.shape_cast %83 : vector<2x32xf32> to vector<1x2x32xf32>
    tpu.vector_store %arg5[%c0_36, %84, %c0_37], %87 {strides = array<i32>} : memref<1x16x32xf32, #tpu.memory_space<vmem>>, vector<1x2x32xf32>,
    %c2_i32_38 = arith.constant 2 : i32
    %c0_i32_39 = arith.constant 0 : i32
    %88 = arith.cmpi eq, %arg0, %c0_i32_39 : i32
    %c7_i32_40 = arith.constant 7 : i32
    %89 = arith.subi %c7_i32_40, %c2_i32_38 : i32
    %90 = arith.select %88, %c2_i32_38, %89 : i32
    %c2_i32_41 = arith.constant 2 : i32
    %91 = arith.muli %90, %c2_i32_41 : i32
    %92 = arith.index_cast %91 : i32 to index
    %c0_42 = arith.constant 0 : index
    %93 = vector.load %arg6[%92, %c0_42] : memref<16x128xf32, #tpu.memory_space<vmem>>, vector<2x128xf32>
    %94 = arith.truncf %83 : vector<2x32xf32> to vector<2x32xbf16>
    %cst_43 = arith.constant dense<0.000000e+00> : vector<2x128xf32>
    %95 = tpu.matmul %94, %21, %cst_43 {dimension_numbers = #tpu.dot_dimension_numbers<[1], [0], [0], [1], [0, 0, 1, 1], [], []>} : vector<2x32xbf16>, vector<32x128xbf16>, vector<2x128xf32> -> vector<2x128xf32>
    %96 = arith.addf %93, %95 : vector<2x128xf32>
    %97 = math.tanh %96 : vector<2x128xf32>
    %98 = arith.negf %96 : vector<2x128xf32>
    %99 = math.exp %98 : vector<2x128xf32>
    %cst_44 = arith.constant 1.000000e+00 : f32
    %100 = vector.broadcast %cst_44 : f32 to vector<2x128xf32>
    %101 = arith.addf %100, %99 : vector<2x128xf32>
    %102 = arith.divf %100, %101 : vector<2x128xf32>
    %103 = arith.select %27, %97, %102 : vector<2x128xi1>, vector<2x128xf32>
    %104 = vector.extract_strided_slice %103 {offsets = [0, 0], sizes = [2, 32], strides = [1, 1]} : vector<2x128xf32> to vector<2x32xf32>
    %105 = vector.extract_strided_slice %103 {offsets = [0, 32], sizes = [2, 32], strides = [1, 1]} : vector<2x128xf32> to vector<2x32xf32>
    %106 = vector.extract_strided_slice %103 {offsets = [0, 64], sizes = [2, 32], strides = [1, 1]} : vector<2x128xf32> to vector<2x32xf32>
    %107 = vector.extract_strided_slice %103 {offsets = [0, 96], sizes = [2, 32], strides = [1, 1]} : vector<2x128xf32> to vector<2x32xf32>
    %108 = arith.mulf %105, %81 : vector<2x32xf32>
    %109 = arith.mulf %104, %106 : vector<2x32xf32>
    %110 = arith.addf %108, %109 : vector<2x32xf32>
    %111 = math.tanh %110 : vector<2x32xf32>
    %112 = arith.mulf %107, %111 : vector<2x32xf32>
    %c0_45 = arith.constant 0 : index
    %113 = arith.index_cast %91 : i32 to index
    %c0_46 = arith.constant 0 : index
    %114 = vector.load %arg5[%c0_45, %113, %c0_46] : memref<1x16x32xf32, #tpu.memory_space<vmem>>, vector<1x2x32xf32>
    %115 = vector.shape_cast %114 : vector<1x2x32xf32> to vector<2x32xf32>
    %116 = vector.shape_cast %112 : vector<2x32xf32> to vector<1x2x32xf32>
    tpu.vector_store %arg5[%c0_45, %113, %c0_46], %116 {strides = array<i32>} : memref<1x16x32xf32, #tpu.memory_space<vmem>>, vector<1x2x32xf32>,
    %c3_i32 = arith.constant 3 : i32
    %c0_i32_47 = arith.constant 0 : i32
    %117 = arith.cmpi eq, %arg0, %c0_i32_47 : i32
    %c7_i32_48 = arith.constant 7 : i32
    %118 = arith.subi %c7_i32_48, %c3_i32 : i32
    %119 = arith.select %117, %c3_i32, %118 : i32
    %c2_i32_49 = arith.constant 2 : i32
    %120 = arith.muli %119, %c2_i32_49 : i32
    %121 = arith.index_cast %120 : i32 to index
    %c0_50 = arith.constant 0 : index
    %122 = vector.load %arg6[%121, %c0_50] : memref<16x128xf32, #tpu.memory_space<vmem>>, vector<2x128xf32>
    %123 = arith.truncf %112 : vector<2x32xf32> to vector<2x32xbf16>
    %cst_51 = arith.constant dense<0.000000e+00> : vector<2x128xf32>
    %124 = tpu.matmul %123, %21, %cst_51 {dimension_numbers = #tpu.dot_dimension_numbers<[1], [0], [0], [1], [0, 0, 1, 1], [], []>} : vector<2x32xbf16>, vector<32x128xbf16>, vector<2x128xf32> -> vector<2x128xf32>
    %125 = arith.addf %122, %124 : vector<2x128xf32>
    %126 = math.tanh %125 : vector<2x128xf32>
    %127 = arith.negf %125 : vector<2x128xf32>
    %128 = math.exp %127 : vector<2x128xf32>
    %cst_52 = arith.constant 1.000000e+00 : f32
    %129 = vector.broadcast %cst_52 : f32 to vector<2x128xf32>
    %130 = arith.addf %129, %128 : vector<2x128xf32>
    %131 = arith.divf %129, %130 : vector<2x128xf32>
    %132 = arith.select %27, %126, %131 : vector<2x128xi1>, vector<2x128xf32>
    %133 = vector.extract_strided_slice %132 {offsets = [0, 0], sizes = [2, 32], strides = [1, 1]} : vector<2x128xf32> to vector<2x32xf32>
    %134 = vector.extract_strided_slice %132 {offsets = [0, 32], sizes = [2, 32], strides = [1, 1]} : vector<2x128xf32> to vector<2x32xf32>
    %135 = vector.extract_strided_slice %132 {offsets = [0, 64], sizes = [2, 32], strides = [1, 1]} : vector<2x128xf32> to vector<2x32xf32>
    %136 = vector.extract_strided_slice %132 {offsets = [0, 96], sizes = [2, 32], strides = [1, 1]} : vector<2x128xf32> to vector<2x32xf32>
    %137 = arith.mulf %134, %110 : vector<2x32xf32>
    %138 = arith.mulf %133, %135 : vector<2x32xf32>
    %139 = arith.addf %137, %138 : vector<2x32xf32>
    %140 = math.tanh %139 : vector<2x32xf32>
    %141 = arith.mulf %136, %140 : vector<2x32xf32>
    %c0_53 = arith.constant 0 : index
    %142 = arith.index_cast %120 : i32 to index
    %c0_54 = arith.constant 0 : index
    %143 = vector.load %arg5[%c0_53, %142, %c0_54] : memref<1x16x32xf32, #tpu.memory_space<vmem>>, vector<1x2x32xf32>
    %144 = vector.shape_cast %143 : vector<1x2x32xf32> to vector<2x32xf32>
    %145 = vector.shape_cast %141 : vector<2x32xf32> to vector<1x2x32xf32>
    tpu.vector_store %arg5[%c0_53, %142, %c0_54], %145 {strides = array<i32>} : memref<1x16x32xf32, #tpu.memory_space<vmem>>, vector<1x2x32xf32>,
    %c4_i32 = arith.constant 4 : i32
    %c0_i32_55 = arith.constant 0 : i32
    %146 = arith.cmpi eq, %arg0, %c0_i32_55 : i32
    %c7_i32_56 = arith.constant 7 : i32
    %147 = arith.subi %c7_i32_56, %c4_i32 : i32
    %148 = arith.select %146, %c4_i32, %147 : i32
    %c2_i32_57 = arith.constant 2 : i32
    %149 = arith.muli %148, %c2_i32_57 : i32
    %150 = arith.index_cast %149 : i32 to index
    %c0_58 = arith.constant 0 : index
    %151 = vector.load %arg6[%150, %c0_58] : memref<16x128xf32, #tpu.memory_space<vmem>>, vector<2x128xf32>
    %152 = arith.truncf %141 : vector<2x32xf32> to vector<2x32xbf16>
    %cst_59 = arith.constant dense<0.000000e+00> : vector<2x128xf32>
    %153 = tpu.matmul %152, %21, %cst_59 {dimension_numbers = #tpu.dot_dimension_numbers<[1], [0], [0], [1], [0, 0, 1, 1], [], []>} : vector<2x32xbf16>, vector<32x128xbf16>, vector<2x128xf32> -> vector<2x128xf32>
    %154 = arith.addf %151, %153 : vector<2x128xf32>
    %155 = math.tanh %154 : vector<2x128xf32>
    %156 = arith.negf %154 : vector<2x128xf32>
    %157 = math.exp %156 : vector<2x128xf32>
    %cst_60 = arith.constant 1.000000e+00 : f32
    %158 = vector.broadcast %cst_60 : f32 to vector<2x128xf32>
    %159 = arith.addf %158, %157 : vector<2x128xf32>
    %160 = arith.divf %158, %159 : vector<2x128xf32>
    %161 = arith.select %27, %155, %160 : vector<2x128xi1>, vector<2x128xf32>
    %162 = vector.extract_strided_slice %161 {offsets = [0, 0], sizes = [2, 32], strides = [1, 1]} : vector<2x128xf32> to vector<2x32xf32>
    %163 = vector.extract_strided_slice %161 {offsets = [0, 32], sizes = [2, 32], strides = [1, 1]} : vector<2x128xf32> to vector<2x32xf32>
    %164 = vector.extract_strided_slice %161 {offsets = [0, 64], sizes = [2, 32], strides = [1, 1]} : vector<2x128xf32> to vector<2x32xf32>
    %165 = vector.extract_strided_slice %161 {offsets = [0, 96], sizes = [2, 32], strides = [1, 1]} : vector<2x128xf32> to vector<2x32xf32>
    %166 = arith.mulf %163, %139 : vector<2x32xf32>
    %167 = arith.mulf %162, %164 : vector<2x32xf32>
    %168 = arith.addf %166, %167 : vector<2x32xf32>
    %169 = math.tanh %168 : vector<2x32xf32>
    %170 = arith.mulf %165, %169 : vector<2x32xf32>
    %c0_61 = arith.constant 0 : index
    %171 = arith.index_cast %149 : i32 to index
    %c0_62 = arith.constant 0 : index
    %172 = vector.load %arg5[%c0_61, %171, %c0_62] : memref<1x16x32xf32, #tpu.memory_space<vmem>>, vector<1x2x32xf32>
    %173 = vector.shape_cast %172 : vector<1x2x32xf32> to vector<2x32xf32>
    %174 = vector.shape_cast %170 : vector<2x32xf32> to vector<1x2x32xf32>
    tpu.vector_store %arg5[%c0_61, %171, %c0_62], %174 {strides = array<i32>} : memref<1x16x32xf32, #tpu.memory_space<vmem>>, vector<1x2x32xf32>,
    %c5_i32 = arith.constant 5 : i32
    %c0_i32_63 = arith.constant 0 : i32
    %175 = arith.cmpi eq, %arg0, %c0_i32_63 : i32
    %c7_i32_64 = arith.constant 7 : i32
    %176 = arith.subi %c7_i32_64, %c5_i32 : i32
    %177 = arith.select %175, %c5_i32, %176 : i32
    %c2_i32_65 = arith.constant 2 : i32
    %178 = arith.muli %177, %c2_i32_65 : i32
    %179 = arith.index_cast %178 : i32 to index
    %c0_66 = arith.constant 0 : index
    %180 = vector.load %arg6[%179, %c0_66] : memref<16x128xf32, #tpu.memory_space<vmem>>, vector<2x128xf32>
    %181 = arith.truncf %170 : vector<2x32xf32> to vector<2x32xbf16>
    %cst_67 = arith.constant dense<0.000000e+00> : vector<2x128xf32>
    %182 = tpu.matmul %181, %21, %cst_67 {dimension_numbers = #tpu.dot_dimension_numbers<[1], [0], [0], [1], [0, 0, 1, 1], [], []>} : vector<2x32xbf16>, vector<32x128xbf16>, vector<2x128xf32> -> vector<2x128xf32>
    %183 = arith.addf %180, %182 : vector<2x128xf32>
    %184 = math.tanh %183 : vector<2x128xf32>
    %185 = arith.negf %183 : vector<2x128xf32>
    %186 = math.exp %185 : vector<2x128xf32>
    %cst_68 = arith.constant 1.000000e+00 : f32
    %187 = vector.broadcast %cst_68 : f32 to vector<2x128xf32>
    %188 = arith.addf %187, %186 : vector<2x128xf32>
    %189 = arith.divf %187, %188 : vector<2x128xf32>
    %190 = arith.select %27, %184, %189 : vector<2x128xi1>, vector<2x128xf32>
    %191 = vector.extract_strided_slice %190 {offsets = [0, 0], sizes = [2, 32], strides = [1, 1]} : vector<2x128xf32> to vector<2x32xf32>
    %192 = vector.extract_strided_slice %190 {offsets = [0, 32], sizes = [2, 32], strides = [1, 1]} : vector<2x128xf32> to vector<2x32xf32>
    %193 = vector.extract_strided_slice %190 {offsets = [0, 64], sizes = [2, 32], strides = [1, 1]} : vector<2x128xf32> to vector<2x32xf32>
    %194 = vector.extract_strided_slice %190 {offsets = [0, 96], sizes = [2, 32], strides = [1, 1]} : vector<2x128xf32> to vector<2x32xf32>
    %195 = arith.mulf %192, %168 : vector<2x32xf32>
    %196 = arith.mulf %191, %193 : vector<2x32xf32>
    %197 = arith.addf %195, %196 : vector<2x32xf32>
    %198 = math.tanh %197 : vector<2x32xf32>
    %199 = arith.mulf %194, %198 : vector<2x32xf32>
    %c0_69 = arith.constant 0 : index
    %200 = arith.index_cast %178 : i32 to index
    %c0_70 = arith.constant 0 : index
    %201 = vector.load %arg5[%c0_69, %200, %c0_70] : memref<1x16x32xf32, #tpu.memory_space<vmem>>, vector<1x2x32xf32>
    %202 = vector.shape_cast %201 : vector<1x2x32xf32> to vector<2x32xf32>
    %203 = vector.shape_cast %199 : vector<2x32xf32> to vector<1x2x32xf32>
    tpu.vector_store %arg5[%c0_69, %200, %c0_70], %203 {strides = array<i32>} : memref<1x16x32xf32, #tpu.memory_space<vmem>>, vector<1x2x32xf32>,
    %c6_i32 = arith.constant 6 : i32
    %c0_i32_71 = arith.constant 0 : i32
    %204 = arith.cmpi eq, %arg0, %c0_i32_71 : i32
    %c7_i32_72 = arith.constant 7 : i32
    %205 = arith.subi %c7_i32_72, %c6_i32 : i32
    %206 = arith.select %204, %c6_i32, %205 : i32
    %c2_i32_73 = arith.constant 2 : i32
    %207 = arith.muli %206, %c2_i32_73 : i32
    %208 = arith.index_cast %207 : i32 to index
    %c0_74 = arith.constant 0 : index
    %209 = vector.load %arg6[%208, %c0_74] : memref<16x128xf32, #tpu.memory_space<vmem>>, vector<2x128xf32>
    %210 = arith.truncf %199 : vector<2x32xf32> to vector<2x32xbf16>
    %cst_75 = arith.constant dense<0.000000e+00> : vector<2x128xf32>
    %211 = tpu.matmul %210, %21, %cst_75 {dimension_numbers = #tpu.dot_dimension_numbers<[1], [0], [0], [1], [0, 0, 1, 1], [], []>} : vector<2x32xbf16>, vector<32x128xbf16>, vector<2x128xf32> -> vector<2x128xf32>
    %212 = arith.addf %209, %211 : vector<2x128xf32>
    %213 = math.tanh %212 : vector<2x128xf32>
    %214 = arith.negf %212 : vector<2x128xf32>
    %215 = math.exp %214 : vector<2x128xf32>
    %cst_76 = arith.constant 1.000000e+00 : f32
    %216 = vector.broadcast %cst_76 : f32 to vector<2x128xf32>
    %217 = arith.addf %216, %215 : vector<2x128xf32>
    %218 = arith.divf %216, %217 : vector<2x128xf32>
    %219 = arith.select %27, %213, %218 : vector<2x128xi1>, vector<2x128xf32>
    %220 = vector.extract_strided_slice %219 {offsets = [0, 0], sizes = [2, 32], strides = [1, 1]} : vector<2x128xf32> to vector<2x32xf32>
    %221 = vector.extract_strided_slice %219 {offsets = [0, 32], sizes = [2, 32], strides = [1, 1]} : vector<2x128xf32> to vector<2x32xf32>
    %222 = vector.extract_strided_slice %219 {offsets = [0, 64], sizes = [2, 32], strides = [1, 1]} : vector<2x128xf32> to vector<2x32xf32>
    %223 = vector.extract_strided_slice %219 {offsets = [0, 96], sizes = [2, 32], strides = [1, 1]} : vector<2x128xf32> to vector<2x32xf32>
    %224 = arith.mulf %221, %197 : vector<2x32xf32>
    %225 = arith.mulf %220, %222 : vector<2x32xf32>
    %226 = arith.addf %224, %225 : vector<2x32xf32>
    %227 = math.tanh %226 : vector<2x32xf32>
    %228 = arith.mulf %223, %227 : vector<2x32xf32>
    %c0_77 = arith.constant 0 : index
    %229 = arith.index_cast %207 : i32 to index
    %c0_78 = arith.constant 0 : index
    %230 = vector.load %arg5[%c0_77, %229, %c0_78] : memref<1x16x32xf32, #tpu.memory_space<vmem>>, vector<1x2x32xf32>
    %231 = vector.shape_cast %230 : vector<1x2x32xf32> to vector<2x32xf32>
    %232 = vector.shape_cast %228 : vector<2x32xf32> to vector<1x2x32xf32>
    tpu.vector_store %arg5[%c0_77, %229, %c0_78], %232 {strides = array<i32>} : memref<1x16x32xf32, #tpu.memory_space<vmem>>, vector<1x2x32xf32>,
    %c7_i32_79 = arith.constant 7 : i32
    %c0_i32_80 = arith.constant 0 : i32
    %233 = arith.cmpi eq, %arg0, %c0_i32_80 : i32
    %c7_i32_81 = arith.constant 7 : i32
    %234 = arith.subi %c7_i32_81, %c7_i32_79 : i32
    %235 = arith.select %233, %c7_i32_79, %234 : i32
    %c2_i32_82 = arith.constant 2 : i32
    %236 = arith.muli %235, %c2_i32_82 : i32
    %237 = arith.index_cast %236 : i32 to index
    %c0_83 = arith.constant 0 : index
    %238 = vector.load %arg6[%237, %c0_83] : memref<16x128xf32, #tpu.memory_space<vmem>>, vector<2x128xf32>
    %239 = arith.truncf %228 : vector<2x32xf32> to vector<2x32xbf16>
    %cst_84 = arith.constant dense<0.000000e+00> : vector<2x128xf32>
    %240 = tpu.matmul %239, %21, %cst_84 {dimension_numbers = #tpu.dot_dimension_numbers<[1], [0], [0], [1], [0, 0, 1, 1], [], []>} : vector<2x32xbf16>, vector<32x128xbf16>, vector<2x128xf32> -> vector<2x128xf32>
    %241 = arith.addf %238, %240 : vector<2x128xf32>
    %242 = math.tanh %241 : vector<2x128xf32>
    %243 = arith.negf %241 : vector<2x128xf32>
    %244 = math.exp %243 : vector<2x128xf32>
    %cst_85 = arith.constant 1.000000e+00 : f32
    %245 = vector.broadcast %cst_85 : f32 to vector<2x128xf32>
    %246 = arith.addf %245, %244 : vector<2x128xf32>
    %247 = arith.divf %245, %246 : vector<2x128xf32>
    %248 = arith.select %27, %242, %247 : vector<2x128xi1>, vector<2x128xf32>
    %249 = vector.extract_strided_slice %248 {offsets = [0, 0], sizes = [2, 32], strides = [1, 1]} : vector<2x128xf32> to vector<2x32xf32>
    %250 = vector.extract_strided_slice %248 {offsets = [0, 32], sizes = [2, 32], strides = [1, 1]} : vector<2x128xf32> to vector<2x32xf32>
    %251 = vector.extract_strided_slice %248 {offsets = [0, 64], sizes = [2, 32], strides = [1, 1]} : vector<2x128xf32> to vector<2x32xf32>
    %252 = vector.extract_strided_slice %248 {offsets = [0, 96], sizes = [2, 32], strides = [1, 1]} : vector<2x128xf32> to vector<2x32xf32>
    %253 = arith.mulf %250, %226 : vector<2x32xf32>
    %254 = arith.mulf %249, %251 : vector<2x32xf32>
    %255 = arith.addf %253, %254 : vector<2x32xf32>
    %256 = math.tanh %255 : vector<2x32xf32>
    %257 = arith.mulf %252, %256 : vector<2x32xf32>
    %c0_86 = arith.constant 0 : index
    %258 = arith.index_cast %236 : i32 to index
    %c0_87 = arith.constant 0 : index
    %259 = vector.load %arg5[%c0_86, %258, %c0_87] : memref<1x16x32xf32, #tpu.memory_space<vmem>>, vector<1x2x32xf32>
    %260 = vector.shape_cast %259 : vector<1x2x32xf32> to vector<2x32xf32>
    %261 = vector.shape_cast %257 : vector<2x32xf32> to vector<1x2x32xf32>
    tpu.vector_store %arg5[%c0_86, %258, %c0_87], %261 {strides = array<i32>} : memref<1x16x32xf32, #tpu.memory_space<vmem>>, vector<1x2x32xf32>,
    %c8_i32 = arith.constant 8 : i32
    return
  }
  func.func @transform_0(%arg0: i32) -> (i32, i32, i32) {
    %c0_i32 = arith.constant 0 : i32
    %c0_i32_0 = arith.constant 0 : i32
    %c0_i32_1 = arith.constant 0 : i32
    %c0_i32_2 = arith.constant 0 : i32
    return %c0_i32, %c0_i32_0, %c0_i32_1 : i32, i32, i32
  }
  func.func @transform_1(%arg0: i32) -> (i32, i32, i32, i32) {
    %c0_i32 = arith.constant 0 : i32
    %c0_i32_0 = arith.constant 0 : i32
    %c0_i32_1 = arith.constant 0 : i32
    %c0_i32_2 = arith.constant 0 : i32
    return %arg0, %c0_i32, %c0_i32_0, %c0_i32_1 : i32, i32, i32, i32
  }
  func.func @transform_2(%arg0: i32) -> (i32, i32, i32) {
    %c0_i32 = arith.constant 0 : i32
    %c0_i32_0 = arith.constant 0 : i32
    %c0_i32_1 = arith.constant 0 : i32
    return %arg0, %c0_i32, %c0_i32_0 : i32, i32, i32
  }
  func.func @transform_3(%arg0: i32) -> (i32, i32, i32) {
    %c0_i32 = arith.constant 0 : i32
    %c0_i32_0 = arith.constant 0 : i32
    %c0_i32_1 = arith.constant 0 : i32
    return %arg0, %c0_i32, %c0_i32_0 : i32, i32, i32
  }
  func.func @transform_4(%arg0: i32) -> (i32, i32, i32) {
    %c0_i32 = arith.constant 0 : i32
    %c0_i32_0 = arith.constant 0 : i32
    %c0_i32_1 = arith.constant 0 : i32
    return %arg0, %c0_i32, %c0_i32_0 : i32, i32, i32
  }
}

</mosaic_0001>

<bundles_post_ra>
// kernel: bilstm_forward.2
= control target key start
LH: loop header
LB: loop body
LE: loop exit
PB: predicated region body
PF: predicated region fallthrough
CT: control target
= control target key end

     0   :  { %s1348_s15 = smov 0   ;;  %s1632_s0 = inlined_call_operand.vmem [shape: f32[1,16,16], index: 0, kind: input, shape index: {}]   ;;  %s1633_s1 = inlined_call_operand.vmem [shape: bf16[2,1,16,128], index: 1, kind: input, shape index: {}]   ;;  %s1634_s2 = inlined_call_operand.vmem [shape: bf16[2,32,128], index: 2, kind: input, shape index: {}]   ;;  %s1635_s3 = inlined_call_operand.vmem [shape: f32[2,1,128], index: 3, kind: input, shape index: {}]   ;;  %s1636_s4 = inlined_call_operand.vmem [shape: f32[2,16,32], index: 4, kind: output, shape index: {}]  }
   0x1 LB: > { %s1354_s16 = sadd.s32 4294967295, %s1316_s15   ;;  %p1094_p0 = scmp.ge.s32.totalorder %s1316_s15, 1  ;;  %s1316_s15 = sphi %s1348_s15, %s14_s15  }
   0x2   : > { %p180_p1 = scmp.lt.s32.totalorder %s1316_s15, 3 }
   0x4   : > { %p181_p2 = pnand %p1094_p0, %p180_p1 }
   0x5   : > { %p214_p3 = scmp.lt.s32.totalorder (!%p181_p2), %s1354_s16, 1  ;;  %v1318_v0 = vmov (!%p181_p2), 0.0   ;;  %vm1319_vm0 = vmmov (!%p181_p2), 0   ;;  %v233_v1 = vld [vmem:[%s1632_s0] sm:$0xff] (!%p181_p2)  ;;  %v234_v2 = vld [vmem:[%s1632_s0 + $0x8] sm:$0xff] (!%p181_p2)  ;;  %vm251_vm1 = vcmask (!%p181_p2), 130048   ;;  %v302_v23 = vlaneseq (!%p181_p2) }
   0x6   : > { %184 = sbr.rel (%p181_p2) target bundleno = 5792 (0x16a0), region = 36  ;;  %1160 = vmatprep.subr.bf16.mxu0 (!%p181_p2), %v1318_v0  ;;  %1162 = vmatprep.mubr.msk.bf16.mxu0 (!%p181_p2), %vm1319_vm0, %v1318_v0  ;;  %v235_v4 = vpack.c.bf16 (!%p181_p2), %v234_v2, %v233_v1  ;;  %v1320_v7 = vmov (!%p181_p2), 0   ;;  %p307_p4 = scmp.eq.s32.totalorder (!%p181_p2), %s1354_s16, 0  ;;  %vm324_vm5 = vcmask (!%p181_p2), 261120   ;;  %vm399_vm6 = vcmask (!%p181_p2), 254976  }
   0x7   : > { %1166 = vmatprep.subr.bf16.mxu1 (!%p181_p2), %v1318_v0  ;;  %1170 = vmatprep.mubr.msk.bf16.mxu1 (!%p181_p2), %vm1319_vm0, %v1318_v0  ;;  %v303_v25 = vand.u32 (!%p181_p2), 127, %v302_v23  ;;  %s1321_s10 = smov (!%p181_p2), 64   ;;  %s1322_s11 = smov (!%p181_p2), 32  }
   0x9   : > { %vm304_vm2 = vcmp.ge.s32.totalorder (!%p181_p2), %v303_v25, 64  ;;  %vm305_vm3 = vcmp.lt.s32.totalorder (!%p181_p2), %v303_v25, 96 }
   0xa   : > { %vm1417_vm4 = vmand (!%p181_p2), %vm304_vm2, %vm305_vm3 }
   0xd   : > { %s1363_s17 = scalar_select %p214_p3, %s1354_s16, 1 }
   0xe   : > { %s1412_s7 = scalar_select %p307_p4, 0, 7 }
   0xf   : > { %s1131_s18 = sshll.u32 %s1363_s17, 3  ;;  %s1132_s19 = sshll.u32 %s1363_s17, 4 }
  0x10   : > { %s218_s26 = scalar_lea.vmem %s1633_s1, %s1131_s18  ;;  %s223_s29 = scalar_lea.vmem %s1634_s2, %s1132_s19 }
  0x11   : > { %v1243_v3 = vld [vmem:[%s218_s26] sm:$0xff]   ;;  %v1387_v6 = vld [vmem:[%s223_s29 + $0x8] sm:$0xff]   ;;  %s226_s6 = scalar_lea.vmem %s1635_s3, %s1363_s17  ;;  %s1104_s8 = sshll.u32 %s1412_s7, 1 }
  0x12   : > { %1161 = vmatpush3.bf16.msra.mxu0 %v1243_v3  ;;  %v1384_v5 = vld [vmem:[%s223_s29] sm:$0xff]   ;;  %s310_s9 = scalar_lea.vmem [#allocation2], %s1104_s8 }
  0x13   : > { %1174 = vmatprep.subr.bf16.mxu0 %v1318_v0  ;;  %1167 = vmatpush3.bf16.msra.mxu1 %v1384_v5  ;;  %v1101_v8 = vld [vmem:[%s226_s6] ss:$0 sm:$0xff]  ;;  %s1440_s12 = scalar_select %p307_p4, 1, 6 }
  0x14   : > { %1168 = vmatprep.subr.bf16.mxu1 %v1318_v0  ;;  %s1464_s18 = scalar_select %p307_p4, 2, 5 }
  0x15   : > { %1163 = vmatmul.mubr.msk.bf16.vlgmr.msra.gmra.mrb[0].mxu0 %vm251_vm1, %v235_v4  ;;  %s1108_s13 = sshll.u32 %s1440_s12, 1 }
  0x16   : > { %1175 = vmatpush3.bf16.msra.mxu0 %v1384_v5  ;;  %1178 = vmatprep.mubr.msk.bf16.mxu0 %vm1319_vm0, %v1318_v0  ;;  %s403_s14 = scalar_lea.vmem [#allocation2], %s1108_s13  ;;  %s1111_s20 = sshll.u32 %s1464_s18, 1 }
  0x17   : > { %1176 = vmatprep.subr.bf16.mxu0 %v1318_v0  ;;  %1169 = vmatpush3.bf16.msra.mxu1 %v1387_v6  ;;  %s486_s21 = scalar_lea.vmem [#allocation2], %s1111_s20 }
  0x18   : > { %1182 = vmatprep.subr.bf16.mxu1 %v1318_v0  ;;  %s1488_s22 = scalar_select %p307_p4, 3, 4 }
  0x19   : > { %s1511_s25 = scalar_select %p307_p4, 4, 3 }
  0x1a   : > { %1177 = vmatpush3.bf16.msra.mxu0 %v1387_v6  ;;  %1171 = vmatmul.mubr.bf16.vlgmr.msra.gmra.mrb[0].mxu1 %v1320_v7  ;;  %s1114_s23 = sshll.u32 %s1488_s22, 1 }
  0x1b   : > { %1190 = vmatprep.subr.bf16.mxu0 %v1318_v0  ;;  %1183 = vmatpush3.bf16.msra.mxu1 %v1384_v5  ;;  %s569_s24 = scalar_lea.vmem [#allocation2], %s1114_s23  ;;  %s1117_s26 = sshll.u32 %s1511_s25, 1 }
  0x1c   : > { %1186 = vmatprep.mubr.msk.bf16.mxu1 %vm1319_vm0, %v1318_v0  ;;  %1184 = vmatprep.subr.bf16.mxu1 %v1318_v0  ;;  %s652_s27 = scalar_lea.vmem [#allocation2], %s1117_s26 }
  0x1d   : > { %s1534_s28 = scalar_select %p307_p4, 5, 2 }
  0x1e   : > { %s1552_s5 = scalar_select %p307_p4, 6, 1 }
  0x1f   : > { %1185 = vmatpush3.bf16.msra.mxu1 %v1387_v6  ;;  %s1120_s29 = sshll.u32 %s1534_s28, 1 }
  0x20   : > { %1198 = vmatprep.subr.bf16.mxu1 %v1318_v0  ;;  %s735_s30 = scalar_lea.vmem [#allocation2], %s1120_s29  ;;  %s1123_s6 = sshll.u32 %s1552_s5, 1 }
  0xe8   : > { %v289_v9 = vpop.f32.mrb[0].mxu0 }
  0xe9   : > { %v290_v10 = vadd.f32 %v1101_v8, %v289_v9  ;;  %v1164_v11 = vpop.f32.mrb[1].mxu0 }
  0xea   : > { %v292_v12 = vpop.f32.mrb[2].mxu0 }
  0xeb   : > { %296 = vst [vmem:[#allocation2] sm:$0xff] %v290_v10  ;;  %v293_v13 = vadd.f32 %v1101_v8, %v292_v12  ;;  %v1165_v14 = vpop.f32.mrb[3].mxu0 }
  0xed   : > { %297 = vst [vmem:[#allocation2 + $0x8] sm:$0xff] %v293_v13  ;;  %v362_v15 = vpop.f32.mrb[0].mxu1 }
  0xee   : > { %v1172_v16 = vpop.f32.mrb[1].mxu1 }
  0xef   : > { %v365_v17 = vpop.f32.mrb[2].mxu1 }
  0xf0   : > { %v1173_v18 = vpop.f32.mrb[3].mxu1 }
  0xf4   : > { %v311_v19 = vld [vmem:[%s310_s9] sm:$0x3]  ;;  %s818_s9 = scalar_lea.vmem [#allocation2], %s1123_s6 }
  0xf5   : > { %v368_v20 = vadd.f32 %v362_v15, %v311_v19  ;;  %v404_v40 = vld [vmem:[%s403_s14] sm:$0x3]  ;;  %s1566_s14 = scalar_select %p307_p4, 7, 0 }
  0xf6   : > { %v487_v62 = vld [vmem:[%s486_s21] sm:$0x3] }
  0xf7   : > { %v1107_v21 = vmul.f32 -1.442695, %v368_v20  ;;  %v570_v23 = vld [vmem:[%s569_s24] sm:$0x3]  ;;  %s1126_s21 = sshll.u32 %s1566_s14, 1 }
  0xf8   : > { %s901_s24 = scalar_lea.vmem [#allocation2], %s1126_s21 }
  0xf9   : > { %1246 = vpow2.f32 %v1107_v21 }
  0xfa   : > { %1248 = vtanh.f32 %v368_v20 }
 0x103   : > { %v1247_v22 = vpop.eup %1246 }
 0x104   : > { %v373_v24 = vadd.f32 1.0, %v1247_v22  ;;  %v1249_v27 = vpop.eup %1248 }
 0x106   : > { %1250 = vrcp.f32 %v373_v24 }
 0x110   : > { %v1251_v28 = vpop.eup %1250 }
 0x111   : > { %v376_v29 = vsel %vm1417_vm4, %v1249_v27, %v1251_v28 }
 0x112   : > { %379 = vrot.lane.b32.xlu0 %v376_v29, %s1321_s10  ;;  %v377_v32 = vmul.f32 0.0, %v376_v29 }
 0x184   : > { %v380_v30 = vpop.permute.xlu0 %379 }
 0x185   : > { %v382_v31 = vmul.f32 %v380_v30, %v376_v29 }
 0x187   : > { %384 = vrot.lane.b32.xlu0 %v382_v31, %s1322_s11 }
 0x1f9   : > { %v385_v33 = vpop.permute.xlu0 %384 }
 0x1fa   : > { %v387_v34 = vadd.f32 %v385_v33, %v377_v32 }
 0x1fc   : > { %1252 = vtanh.f32 %v387_v34 }
 0x206   : > { %v1253_v35 = vpop.eup %1252 }
 0x207   : > { %390 = vrot.lane.b32.xlu1 %v1253_v35, %s1321_s10 }
 0x279   : > { %v391_v36 = vpop.permute.xlu1 %390 }
 0x27a   : > { %v1426_v37 = vmul.f32 %v391_v36, %v376_v29 }
 0x27c   : > { %v405_v38 = vpack.c.bf16 %v1426_v37, %v1426_v37 }
 0x27e   : > { %407 = vrot.lane.b32.xlu1 %v405_v38, %s1322_s11 }
 0x2f0   : > { %v408_v39 = vpop.permute.xlu1 %407 }
 0x2f1   : > { %1179 = vmatmul.mubr.msk.bf16.vlgmr.msra.gmra.mrb[4].mxu0 %vm324_vm5, %v408_v39 }
 0x2f2   : > { %1191 = vmatpush3.bf16.msra.mxu0 %v1384_v5  ;;  %1194 = vmatprep.mubr.msk.bf16.mxu0 %vm1319_vm0, %v1318_v0 }
 0x2f3   : > { %1192 = vmatprep.subr.bf16.mxu0 %v1318_v0 }
 0x2f6   : > { %1193 = vmatpush3.bf16.msra.mxu0 %v1387_v6 }
 0x2f7   : > { %1206 = vmatprep.subr.bf16.mxu0 %v1318_v0 }
 0x3c4   : > { %v446_v41 = vpop.f32.mrb[4].mxu0 }
 0x3c5   : > { %v452_v42 = vadd.f32 %v446_v41, %v404_v40  ;;  %v1180_v43 = vpop.f32.mrb[5].mxu0 }
 0x3c6   : > { %v449_v44 = vpop.f32.mrb[6].mxu0 }
 0x3c7   : > { %v1110_v45 = vmul.f32 -1.442695, %v452_v42  ;;  %v1181_v46 = vpop.f32.mrb[7].mxu0 }
 0x3c9   : > { %1254 = vpow2.f32 %v1110_v45 }
 0x3ca   : > { %1256 = vtanh.f32 %v452_v42 }
 0x3d3   : > { %v1255_v47 = vpop.eup %1254 }
 0x3d4   : > { %v457_v48 = vadd.f32 1.0, %v1255_v47  ;;  %v1257_v49 = vpop.eup %1256  ;;  %v653_v47 = vld [vmem:[%s652_s27] sm:$0x3] }
 0x3d6   : > { %1258 = vrcp.f32 %v457_v48 }
 0x3e0   : > { %v1259_v50 = vpop.eup %1258 }
 0x3e1   : > { %v460_v51 = vsel %vm1417_vm4, %v1257_v49, %v1259_v50 }
 0x3e2   : > { %463 = vrot.lane.b32.xlu0 %v460_v51, %s1321_s10  ;;  %v461_v54 = vmul.f32 %v460_v51, %v387_v34 }
 0x454   : > { %v464_v52 = vpop.permute.xlu0 %463 }
 0x455   : > { %v466_v53 = vmul.f32 %v464_v52, %v460_v51 }
 0x457   : > { %468 = vrot.lane.b32.xlu1 %v466_v53, %s1322_s11 }
 0x4c9   : > { %v469_v55 = vpop.permute.xlu1 %468 }
 0x4ca   : > { %v471_v56 = vadd.f32 %v469_v55, %v461_v54 }
 0x4cc   : > { %1260 = vtanh.f32 %v471_v56 }
 0x4d6   : > { %v1261_v57 = vpop.eup %1260 }
 0x4d7   : > { %474 = vrot.lane.b32.xlu0 %v1261_v57, %s1321_s10 }
 0x549   : > { %v475_v58 = vpop.permute.xlu0 %474 }
 0x54a   : > { %v1450_v59 = vmul.f32 %v475_v58, %v460_v51 }
 0x54c   : > { %v488_v60 = vpack.c.bf16 %v1450_v59, %v1450_v59 }
 0x54e   : > { %490 = vrot.lane.b32.xlu1 %v488_v60, %s1322_s11 }
 0x5c0   : > { %v491_v61 = vpop.permute.xlu1 %490 }
 0x5c1   : > { %1187 = vmatmul.mubr.msk.bf16.vlgmr.msra.gmra.mrb[4].mxu1 %vm324_vm5, %v491_v61 }
 0x5c2   : > { %1199 = vmatpush3.bf16.msra.mxu1 %v1384_v5  ;;  %1202 = vmatprep.mubr.msk.bf16.mxu1 %vm1319_vm0, %v1318_v0 }
 0x5c3   : > { %1200 = vmatprep.subr.bf16.mxu1 %v1318_v0 }
 0x5c6   : > { %1201 = vmatpush3.bf16.msra.mxu1 %v1387_v6 }
 0x5c7   : > { %1214 = vmatprep.subr.bf16.mxu1 %v1318_v0 }
 0x694   : > { %v529_v63 = vpop.f32.mrb[4].mxu1 }
 0x695   : > { %v535_v1 = vadd.f32 %v529_v63, %v487_v62  ;;  %v1188_v2 = vpop.f32.mrb[5].mxu1 }
 0x696   : > { %v532_v3 = vpop.f32.mrb[6].mxu1 }
 0x697   : > { %v1113_v4 = vmul.f32 -1.442695, %v535_v1  ;;  %v1189_v7 = vpop.f32.mrb[7].mxu1 }
 0x699   : > { %1262 = vpow2.f32 %v1113_v4 }
 0x69a   : > { %1264 = vtanh.f32 %v535_v1 }
 0x6a3   : > { %v1263_v8 = vpop.eup %1262 }
 0x6a4   : > { %v540_v9 = vadd.f32 1.0, %v1263_v8  ;;  %v1265_v10 = vpop.eup %1264 }
 0x6a6   : > { %1266 = vrcp.f32 %v540_v9  ;;  %v736_v9 = vld [vmem:[%s735_s30] sm:$0x3]  ;;  %s1587_s30 = scalar_lea.vmem %s1636_s4, %s1132_s19 }
 0x6a7   : > { %s482_s17 = scalar_lea.vmem %s1587_s30, %s1108_s13  ;;  %s565_s19 = scalar_lea.vmem %s1587_s30, %s1111_s20 }
 0x6a8   : > { %s648_s7 = scalar_lea.vmem %s1587_s30, %s1114_s23  ;;  %s980_s12 = scalar_lea.vmem %s1587_s30, %s1126_s21 }
 0x6b0   : > { %v1267_v11 = vpop.eup %1266 }
 0x6b1   : > { %v543_v12 = vsel %vm1417_vm4, %v1265_v10, %v1267_v11 }
 0x6b2   : > { %546 = vrot.lane.b32.xlu0 %v543_v12, %s1321_s10  ;;  %v544_v15 = vmul.f32 %v543_v12, %v471_v56 }
 0x724   : > { %v547_v13 = vpop.permute.xlu0 %546 }
 0x725   : > { %v549_v14 = vmul.f32 %v547_v13, %v543_v12 }
 0x727   : > { %551 = vrot.lane.b32.xlu1 %v549_v14, %s1322_s11 }
 0x799   : > { %v552_v16 = vpop.permute.xlu1 %551 }
 0x79a   : > { %v554_v17 = vadd.f32 %v552_v16, %v544_v15 }
 0x79c   : > { %1268 = vtanh.f32 %v554_v17 }
 0x7a6   : > { %v1269_v18 = vpop.eup %1268 }
 0x7a7   : > { %557 = vrot.lane.b32.xlu0 %v1269_v18, %s1321_s10 }
 0x819   : > { %v558_v19 = vpop.permute.xlu0 %557 }
 0x81a   : > { %v1474_v20 = vmul.f32 %v558_v19, %v543_v12 }
 0x81c   : > { %v571_v21 = vpack.c.bf16 %v1474_v20, %v1474_v20 }
 0x81e   : > { %573 = vrot.lane.b32.xlu1 %v571_v21, %s1322_s11 }
 0x890   : > { %v574_v22 = vpop.permute.xlu1 %573 }
 0x891   : > { %1195 = vmatmul.mubr.msk.bf16.vlgmr.msra.gmra.mrb[8].mxu0 %vm324_vm5, %v574_v22 }
 0x892   : > { %1207 = vmatpush3.bf16.msra.mxu0 %v1384_v5  ;;  %1210 = vmatprep.mubr.msk.bf16.mxu0 %vm1319_vm0, %v1318_v0 }
 0x893   : > { %1208 = vmatprep.subr.bf16.mxu0 %v1318_v0 }
 0x896   : > { %1209 = vmatpush3.bf16.msra.mxu0 %v1387_v6 }
 0x897   : > { %1222 = vmatprep.subr.bf16.mxu0 %v1318_v0 }
 0x964   : > { %v612_v24 = vpop.f32.mrb[8].mxu0 }
 0x965   : > { %v618_v25 = vadd.f32 %v612_v24, %v570_v23  ;;  %v1196_v27 = vpop.f32.mrb[9].mxu0 }
 0x966   : > { %v615_v28 = vpop.f32.mrb[10].mxu0 }
 0x967   : > { %v1116_v29 = vmul.f32 -1.442695, %v618_v25  ;;  %v1197_v30 = vpop.f32.mrb[11].mxu0 }
 0x968   : > { %v819_v30 = vld [vmem:[%s818_s9] sm:$0x3]  ;;  %s398_s9 = scalar_lea.vmem %s1587_s30, %s1104_s8  ;;  %s731_s8 = scalar_lea.vmem %s1587_s30, %s1117_s26 }
 0x969   : > { %1270 = vpow2.f32 %v1116_v29 }
 0x96a   : > { %1272 = vtanh.f32 %v618_v25 }
 0x973   : > { %v1271_v31 = vpop.eup %1270 }
 0x974   : > { %v623_v32 = vadd.f32 1.0, %v1271_v31  ;;  %v1273_v33 = vpop.eup %1272 }
 0x976   : > { %1274 = vrcp.f32 %v623_v32 }
 0x980   : > { %v1275_v34 = vpop.eup %1274 }
 0x981   : > { %v626_v35 = vsel %vm1417_vm4, %v1273_v33, %v1275_v34 }
 0x982   : > { %629 = vrot.lane.b32.xlu0 %v626_v35, %s1321_s10  ;;  %v627_v39 = vmul.f32 %v626_v35, %v554_v17 }
 0x9f4   : > { %v630_v36 = vpop.permute.xlu0 %629 }
 0x9f5   : > { %v632_v38 = vmul.f32 %v630_v36, %v626_v35 }
 0x9f7   : > { %634 = vrot.lane.b32.xlu1 %v632_v38, %s1322_s11 }
 0xa69   : > { %v635_v40 = vpop.permute.xlu1 %634 }
 0xa6a   : > { %v637_v41 = vadd.f32 %v635_v40, %v627_v39 }
 0xa6c   : > { %1276 = vtanh.f32 %v637_v41 }
 0xa76   : > { %v1277_v42 = vpop.eup %1276 }
 0xa77   : > { %640 = vrot.lane.b32.xlu0 %v1277_v42, %s1321_s10 }
 0xae9   : > { %v641_v43 = vpop.permute.xlu0 %640 }
 0xaea   : > { %v1498_v44 = vmul.f32 %v641_v43, %v626_v35 }
 0xaec   : > { %v654_v45 = vpack.c.bf16 %v1498_v44, %v1498_v44 }
 0xaee   : > { %656 = vrot.lane.b32.xlu1 %v654_v45, %s1322_s11 }
 0xb60   : > { %v657_v46 = vpop.permute.xlu1 %656 }
 0xb61   : > { %1203 = vmatmul.mubr.msk.bf16.vlgmr.msra.gmra.mrb[8].mxu1 %vm324_vm5, %v657_v46 }
 0xb62   : > { %1215 = vmatpush3.bf16.msra.mxu1 %v1384_v5  ;;  %1218 = vmatprep.mubr.msk.bf16.mxu1 %vm1319_vm0, %v1318_v0 }
 0xb63   : > { %1216 = vmatprep.subr.bf16.mxu1 %v1318_v0 }
 0xb66   : > { %1217 = vmatpush3.bf16.msra.mxu1 %v1387_v6 }
 0xc34   : > { %v695_v48 = vpop.f32.mrb[8].mxu1 }
 0xc35   : > { %v701_v49 = vadd.f32 %v695_v48, %v653_v47  ;;  %v1204_v50 = vpop.f32.mrb[9].mxu1 }
 0xc36   : > { %v698_v51 = vpop.f32.mrb[10].mxu1 }
 0xc37   : > { %v1119_v52 = vmul.f32 -1.442695, %v701_v49  ;;  %v1205_v53 = vpop.f32.mrb[11].mxu1 }
 0xc39   : > { %1278 = vpow2.f32 %v1119_v52 }
 0xc3a   : > { %1280 = vtanh.f32 %v701_v49 }
 0xc43   : > { %v1279_v54 = vpop.eup %1278 }
 0xc44   : > { %v706_v55 = vadd.f32 1.0, %v1279_v54  ;;  %v1281_v56 = vpop.eup %1280  ;;  %v902_v54 = vld [vmem:[%s901_s24] sm:$0x3] }
 0xc46   : > { %1282 = vrcp.f32 %v706_v55 }
 0xc50   : > { %v1283_v57 = vpop.eup %1282 }
 0xc51   : > { %v709_v58 = vsel %vm1417_vm4, %v1281_v56, %v1283_v57 }
 0xc52   : > { %712 = vrot.lane.b32.xlu0 %v709_v58, %s1321_s10  ;;  %v710_v62 = vmul.f32 %v709_v58, %v637_v41 }
 0xcc4   : > { %v713_v60 = vpop.permute.xlu0 %712 }
 0xcc5   : > { %v715_v61 = vmul.f32 %v713_v60, %v709_v58 }
 0xcc7   : > { %717 = vrot.lane.b32.xlu1 %v715_v61, %s1322_s11 }
 0xd39   : > { %v718_v63 = vpop.permute.xlu1 %717 }
 0xd3a   : > { %v720_v1 = vadd.f32 %v718_v63, %v710_v62 }
 0xd3c   : > { %1284 = vtanh.f32 %v720_v1 }
 0xd46   : > { %v1285_v2 = vpop.eup %1284 }
 0xd47   : > { %723 = vrot.lane.b32.xlu0 %v1285_v2, %s1321_s10 }
 0xdb9   : > { %v724_v3 = vpop.permute.xlu0 %723 }
 0xdba   : > { %v1521_v4 = vmul.f32 %v724_v3, %v709_v58 }
 0xdbc   : > { %v737_v7 = vpack.c.bf16 %v1521_v4, %v1521_v4 }
 0xdbe   : > { %739 = vrot.lane.b32.xlu1 %v737_v7, %s1322_s11 }
 0xe30   : > { %v740_v8 = vpop.permute.xlu1 %739 }
 0xe31   : > { %1211 = vmatmul.mubr.msk.bf16.vlgmr.msra.gmra.mrb[12].mxu0 %vm324_vm5, %v740_v8 }
 0xe32   : > { %1223 = vmatpush3.bf16.msra.mxu0 %v1384_v5  ;;  %1226 = vmatprep.mubr.msk.bf16.mxu0 %vm1319_vm0, %v1318_v0 }
 0xe33   : > { %1224 = vmatprep.subr.bf16.mxu0 %v1318_v0 }
 0xe36   : > { %1225 = vmatpush3.bf16.msra.mxu0 %v1387_v6 }
 0xf04   : > { %v778_v10 = vpop.f32.mrb[12].mxu0 }
 0xf05   : > { %v784_v11 = vadd.f32 %v778_v10, %v736_v9  ;;  %v1212_v12 = vpop.f32.mrb[13].mxu0 }
 0xf06   : > { %v781_v5 = vpop.f32.mrb[14].mxu0 }
 0xf07   : > { %v1122_v13 = vmul.f32 -1.442695, %v784_v11  ;;  %v1213_v14 = vpop.f32.mrb[15].mxu0 }
 0xf09   : > { %1286 = vpow2.f32 %v1122_v13 }
 0xf0a   : > { %1288 = vtanh.f32 %v784_v11 }
 0xf13   : > { %v1287_v15 = vpop.eup %1286 }
 0xf14   : > { %v789_v0 = vadd.f32 1.0, %v1287_v15  ;;  %v1289_v6 = vpop.eup %1288 }
 0xf16   : > { %1290 = vrcp.f32 %v789_v0 }
 0xf20   : > { %v1291_v16 = vpop.eup %1290 }
 0xf21   : > { %v792_v17 = vsel %vm1417_vm4, %v1289_v6, %v1291_v16 }
 0xf22   : > { %795 = vrot.lane.b32.xlu0 %v792_v17, %s1321_s10  ;;  %v793_v21 = vmul.f32 %v792_v17, %v720_v1 }
 0xf94   : > { %v796_v18 = vpop.permute.xlu0 %795 }
 0xf95   : > { %v798_v19 = vmul.f32 %v796_v18, %v792_v17 }
 0xf97   : > { %800 = vrot.lane.b32.xlu1 %v798_v19, %s1322_s11 }
0x1009   : > { %v801_v22 = vpop.permute.xlu1 %800 }
0x100a   : > { %v803_v23 = vadd.f32 %v801_v22, %v793_v21 }
0x100c   : > { %1292 = vtanh.f32 %v803_v23 }
0x1016   : > { %v1293_v24 = vpop.eup %1292 }
0x1017   : > { %806 = vrot.lane.b32.xlu0 %v1293_v24, %s1321_s10 }
0x1089   : > { %v807_v25 = vpop.permute.xlu0 %806 }
0x108a   : > { %v1544_v27 = vmul.f32 %v807_v25, %v792_v17 }
0x108c   : > { %v820_v28 = vpack.c.bf16 %v1544_v27, %v1544_v27 }
0x108e   : > { %822 = vrot.lane.b32.xlu1 %v820_v28, %s1322_s11 }
0x1100   : > { %v823_v29 = vpop.permute.xlu1 %822 }
0x1101   : > { %1219 = vmatmul.mubr.msk.bf16.vlgmr.msra.gmra.mrb[12].mxu1 %vm324_vm5, %v823_v29 }
0x11d4   : > { %v861_v31 = vpop.f32.mrb[12].mxu1 }
0x11d5   : > { %v867_v32 = vadd.f32 %v861_v31, %v819_v30  ;;  %v1220_v33 = vpop.f32.mrb[13].mxu1 }
0x11d6   : > { %v864_v34 = vpop.f32.mrb[14].mxu1 }
0x11d7   : > { %v1125_v35 = vmul.f32 -1.442695, %v867_v32  ;;  %v1221_v36 = vpop.f32.mrb[15].mxu1 }
0x11d9   : > { %1294 = vpow2.f32 %v1125_v35 }
0x11da   : > { %1296 = vtanh.f32 %v867_v32 }
0x11e3   : > { %v1295_v38 = vpop.eup %1294 }
0x11e4   : > { %v872_v39 = vadd.f32 1.0, %v1295_v38  ;;  %v1297_v40 = vpop.eup %1296 }
0x11e6   : > { %1298 = vrcp.f32 %v872_v39 }
0x11f0   : > { %v1299_v41 = vpop.eup %1298 }
0x11f1   : > { %v875_v42 = vsel %vm1417_vm4, %v1297_v40, %v1299_v41 }
0x11f2   : > { %878 = vrot.lane.b32.xlu0 %v875_v42, %s1321_s10  ;;  %v876_v46 = vmul.f32 %v875_v42, %v803_v23 }
0x1264   : > { %v879_v43 = vpop.permute.xlu0 %878 }
0x1265   : > { %v881_v45 = vmul.f32 %v879_v43, %v875_v42 }
0x1267   : > { %883 = vrot.lane.b32.xlu1 %v881_v45, %s1322_s11 }
0x12d9   : > { %v884_v47 = vpop.permute.xlu1 %883 }
0x12da   : > { %v886_v48 = vadd.f32 %v884_v47, %v876_v46 }
0x12dc   : > { %1300 = vtanh.f32 %v886_v48 }
0x12e6   : > { %v1301_v49 = vpop.eup %1300 }
0x12e7   : > { %889 = vrot.lane.b32.xlu0 %v1301_v49, %s1321_s10 }
0x1359   : > { %v890_v50 = vpop.permute.xlu0 %889 }
0x135a   : > { %v892_v51 = vmul.f32 %v890_v50, %v875_v42 }
0x135c   : > { %v903_v52 = vpack.c.bf16 %v892_v51, %v892_v51 }
0x135e   : > { %905 = vrot.lane.b32.xlu1 %v903_v52, %s1322_s11 }
0x13d0   : > { %v906_v53 = vpop.permute.xlu1 %905 }
0x13d1   : > { %1227 = vmatmul.mubr.msk.bf16.vlgmr.msra.gmra.mrb[16].mxu0 %vm324_vm5, %v906_v53 }
0x14a4   : > { %v944_v55 = vpop.f32.mrb[16].mxu0 }
0x14a5   : > { %v950_v56 = vadd.f32 %v944_v55, %v902_v54  ;;  %v1228_v57 = vpop.f32.mrb[17].mxu0 }
0x14a6   : > { %v947_v58 = vpop.f32.mrb[18].mxu0 }
0x14a7   : > { %v1128_v60 = vmul.f32 -1.442695, %v950_v56  ;;  %v1229_v61 = vpop.f32.mrb[19].mxu0 }
0x14a9   : > { %1302 = vpow2.f32 %v1128_v60 }
0x14aa   : > { %1304 = vtanh.f32 %v950_v56 }
0x14b3   : > { %v1303_v62 = vpop.eup %1302 }
0x14b4   : > { %v955_v63 = vadd.f32 1.0, %v1303_v62  ;;  %v1305_v1 = vpop.eup %1304 }
0x14b6   : > { %1306 = vrcp.f32 %v955_v63 }
0x14c0   : > { %v1307_v2 = vpop.eup %1306 }
0x14c1   : > { %v958_v3 = vsel %vm1417_vm4, %v1305_v1, %v1307_v2 }
0x14c2   : > { %961 = vrot.lane.b32.xlu0 %v958_v3, %s1321_s10  ;;  %v959_v26 = vmul.f32 %v958_v3, %v886_v48 }
0x1534   : > { %v962_v7 = vpop.permute.xlu0 %961 }
0x1535   : > { %v964_v8 = vmul.f32 %v962_v7, %v958_v3 }
0x1537   : > { %966 = vrot.lane.b32.xlu1 %v964_v8, %s1322_s11 }
0x153b   : > { %395 = vrot.lane.b32.xlu1 %v1426_v37, %s1322_s11 }
0x153f   : > { %562 = vrot.lane.b32.xlu1 %v1474_v20, %s1322_s11 }
0x1543   : > { %728 = vrot.lane.b32.xlu1 %v1521_v4, %s1322_s11 }
0x1547   : > { %894 = vrot.lane.b32.xlu1 %v892_v51, %s1322_s11 }
0x15a9   : > { %v967_v9 = vpop.permute.xlu1 %966 }
0x15aa   : > { %v969_v37 = vadd.f32 %v967_v9, %v959_v26 }
0x15ac   : > { %1308 = vtanh.f32 %v969_v37 }
0x15ad   : > { %v396_v20 = vpop.permute.xlu1 %395 }
0x15ae   : > { %400 = vst.msk [vmem:[%s398_s9] sm:$0x3] %vm399_vm6, %v396_v20 }
0x15b1   : > { %v563_v11 = vpop.permute.xlu1 %562 }
0x15b6   : > { %v1309_v4 = vpop.eup %1308 }
0x15b7   : > { %972 = vrot.lane.b32.xlu0 %v1309_v4, %s1321_s10  ;;  %s814_s10 = scalar_lea.vmem %s1587_s30, %s1120_s29 }
0x15bb   : > { %479 = vrot.lane.b32.xlu0 %v1450_v59, %s1322_s11 }
0x15bf   : > { %645 = vrot.lane.b32.xlu0 %v1498_v44, %s1322_s11  ;;  %v729_v44 = vpop.permute.xlu1 %728 }
0x15c3   : > { %811 = vrot.lane.b32.xlu0 %v1544_v27, %s1322_s11  ;;  %v895_v14 = vpop.permute.xlu1 %894 }
0x1629   : > { %v973_v10 = vpop.permute.xlu0 %972 }
0x162a   : > { %v975_v12 = vmul.f32 %v973_v10, %v958_v3 }
0x162c   : > { %977 = vrot.lane.b32.xlu0 %v975_v12, %s1322_s11  ;;  %s897_s11 = scalar_lea.vmem %s1587_s30, %s1123_s6 }
0x162d   : > { %v480_v59 = vpop.permute.xlu0 %479 }
0x162e   : > { %483 = vst.msk [vmem:[%s482_s17] sm:$0x3] %vm399_vm6, %v480_v59 }
0x162f   : > { %566 = vst.msk [vmem:[%s565_s19] sm:$0x3] %vm399_vm6, %v563_v11 }
0x1631   : > { %v646_v5 = vpop.permute.xlu0 %645 }
0x1632   : > { %649 = vst.msk [vmem:[%s648_s7] sm:$0x3] %vm399_vm6, %v646_v5 }
0x1633   : > { %732 = vst.msk [vmem:[%s731_s8] sm:$0x3] %vm399_vm6, %v729_v44 }
0x1635   : > { %v812_v13 = vpop.permute.xlu0 %811 }
0x1636   : > { %815 = vst.msk [vmem:[%s814_s10] sm:$0x3] %vm399_vm6, %v812_v13 }
0x1637   : > { %898 = vst.msk [vmem:[%s897_s11] sm:$0x3] %vm399_vm6, %v895_v14 }
0x169e   : > { %v978_v15 = vpop.permute.xlu0 %977 }
0x169f   : > { %981 = vst.msk [vmem:[%s980_s12] sm:$0x3] %vm399_vm6, %v978_v15 }
0x16a0 PF: > { %s14_s15 = sadd.s32 1, %s1316_s15  }
0x16a1   : > { %p11_p5 = scmp.ge.s32.totalorder %s14_s15, 4  }
0x16a3   :  { %13 = sbr.rel (!%p11_p5) target bundleno = 1 (0x1), region = 88 }

// kernel: bilstm_forward.3
= control target key start
LH: loop header
LB: loop body
LE: loop exit
PB: predicated region body
PF: predicated region fallthrough
CT: control target
= control target key end

     0   :  { %s1449_s15 = smov 0   ;;  %s1746_s0 = inlined_call_operand.vmem [shape: f32[2,16,32], index: 0, kind: input, shape index: {}]   ;;  %s1747_s1 = inlined_call_operand.vmem [shape: bf16[2,2,32,128], index: 1, kind: input, shape index: {}]   ;;  %s1748_s2 = inlined_call_operand.vmem [shape: bf16[2,32,128], index: 2, kind: input, shape index: {}]   ;;  %s1749_s3 = inlined_call_operand.vmem [shape: f32[2,1,128], index: 3, kind: input, shape index: {}]   ;;  %s1750_s4 = inlined_call_operand.vmem [shape: f32[2,16,32], index: 4, kind: output, shape index: {}]  }
   0x1 LB: > { %s1455_s16 = sadd.s32 4294967295, %s1417_s15   ;;  %p1168_p0 = scmp.ge.s32.totalorder %s1417_s15, 1  ;;  %s1417_s15 = sphi %s1449_s15, %s14_s15  }
   0x2   : > { %p180_p1 = scmp.lt.s32.totalorder %s1417_s15, 3 }
   0x4   : > { %p181_p2 = pnand %p1168_p0, %p180_p1 }
   0x5   : > { %p214_p3 = scmp.lt.s32.totalorder (!%p181_p2), %s1455_s16, 1  ;;  %v1419_v0 = vmov (!%p181_p2), 0.0   ;;  %vm1420_vm0 = vmmov (!%p181_p2), 0   ;;  %v1175_v2 = vld [vmem:[%s1746_s0 + $0x10] sm:$0xff] (!%p181_p2)  ;;  %v1176_v3 = vld [vmem:[%s1746_s0 + $0x18] sm:$0xff] (!%p181_p2)  ;;  %v233_v5 = vld [vmem:[%s1746_s0] sm:$0xff] (!%p181_p2)  ;;  %v377_v35 = vlaneseq (!%p181_p2) }
   0x6   : > { %184 = sbr.rel (%p181_p2) target bundleno = 5798 (0x16a6), region = 36  ;;  %1248 = vmatprep.subr.bf16.mxu0 (!%p181_p2), %v1419_v0  ;;  %1256 = vmatprep.subr.bf16.mxu1 (!%p181_p2), %v1419_v0  ;;  %v234_v6 = vld [vmem:[%s1746_s0 + $0x8] sm:$0xff] (!%p181_p2)  ;;  %v243_v9 = vpack.c.bf16 (!%p181_p2), %v1176_v3, %v1175_v2  ;;  %vm261_vm1 = vcmask (!%p181_p2), 261120   ;;  %v1421_v13 = vmov (!%p181_p2), 0   ;;  %p382_p4 = scmp.eq.s32.totalorder (!%p181_p2), %s1455_s16, 0  ;;  %vm473_vm5 = vcmask (!%p181_p2), 254976  }
   0x7   : > { %1252 = vmatprep.mubr.msk.bf16.mxu0 (!%p181_p2), %vm1420_vm0, %v1419_v0  ;;  %1260 = vmatprep.mubr.msk.bf16.mxu1 (!%p181_p2), %vm1420_vm0, %v1419_v0  ;;  %v235_v10 = vpack.c.bf16 (!%p181_p2), %v234_v6, %v233_v5  ;;  %v378_v37 = vand.u32 (!%p181_p2), 127, %v377_v35  ;;  %s1422_s14 = smov (!%p181_p2), 64  }
   0x9   : > { %vm379_vm2 = vcmp.ge.s32.totalorder (!%p181_p2), %v378_v37, 64  ;;  %vm380_vm3 = vcmp.lt.s32.totalorder (!%p181_p2), %v378_v37, 96 }
   0xa   : > { %vm1531_vm4 = vmand (!%p181_p2), %vm379_vm2, %vm380_vm3 }
   0xd   : > { %s1463_s17 = scalar_select %p214_p3, %s1455_s16, 1 }
   0xe   : > { %s1526_s11 = scalar_select %p382_p4, 0, 7 }
   0xf   : > { %s1215_s18 = sshll.u32 %s1463_s17, 5  ;;  %s1216_s22 = sshll.u32 %s1463_s17, 4 }
  0x10   : > { %s218_s21 = scalar_lea.vmem %s1747_s1, %s1215_s18  ;;  %s223_s7 = scalar_lea.vmem %s1748_s2, %s1216_s22 }
  0x11   : > { %v1341_v1 = vld [vmem:[%s218_s21 + $0x10] sm:$0xff]   ;;  %v1342_v4 = vld [vmem:[%s218_s21] sm:$0xff]   ;;  %v1343_v7 = vld [vmem:[%s218_s21 + $0x18] sm:$0xff]   ;;  %s226_s10 = scalar_lea.vmem %s1749_s3, %s1463_s17  ;;  %s1188_s12 = sshll.u32 %s1526_s11, 1 }
  0x12   : > { %1249 = vmatpush3.bf16.msra.mxu0 %v1341_v1  ;;  %1257 = vmatpush3.bf16.msra.mxu1 %v1342_v4  ;;  %v1344_v8 = vld [vmem:[%s218_s21 + $0x8] sm:$0xff]   ;;  %v1493_v11 = vld [vmem:[%s223_s7] sm:$0xff]   ;;  %s385_s13 = scalar_lea.vmem [#allocation2], %s1188_s12  ;;  %s1423_s18 = smov 32  }
  0x13   : > { %1250 = vmatprep.subr.bf16.mxu0 %v1419_v0  ;;  %1258 = vmatprep.subr.bf16.mxu1 %v1419_v0  ;;  %v1500_v12 = vld [vmem:[%s223_s7 + $0x8] sm:$0xff]   ;;  %v1187_v16 = vld [vmem:[%s226_s10] ss:$0 sm:$0xff]  ;;  %s1554_s19 = scalar_select %p382_p4, 1, 6 }
  0x14   : > { %s1578_s23 = scalar_select %p382_p4, 2, 5 }
  0x15   : > { %s1192_s20 = sshll.u32 %s1554_s19, 1 }
  0x16   : > { %1251 = vmatpush3.bf16.msra.mxu0 %v1343_v7  ;;  %1259 = vmatpush3.bf16.msra.mxu1 %v1344_v8  ;;  %s477_s21 = scalar_lea.vmem [#allocation2], %s1192_s20  ;;  %s1195_s24 = sshll.u32 %s1578_s23, 1 }
  0x17   : > { %1264 = vmatprep.subr.bf16.mxu0 %v1419_v0  ;;  %1272 = vmatprep.subr.bf16.mxu1 %v1419_v0  ;;  %s560_s25 = scalar_lea.vmem [#allocation2], %s1195_s24 }
  0x18   : > { %s1602_s26 = scalar_select %p382_p4, 3, 4 }
  0x19   : > { %1253 = vmatmul.mubr.msk.bf16.vlgmr.msra.gmra.mrb[0].mxu0 %vm261_vm1, %v243_v9  ;;  %1261 = vmatmul.mubr.msk.bf16.vlgmr.msra.gmra.mrb[0].mxu1 %vm261_vm1, %v235_v10  ;;  %s1625_s29 = scalar_select %p382_p4, 4, 3 }
  0x1a   : > { %1265 = vmatpush3.bf16.msra.mxu0 %v1493_v11  ;;  %1268 = vmatprep.mubr.msk.bf16.mxu0 %vm1420_vm0, %v1419_v0  ;;  %s1198_s27 = sshll.u32 %s1602_s26, 1 }
  0x1b   : > { %1266 = vmatprep.subr.bf16.mxu0 %v1419_v0  ;;  %1273 = vmatpush3.bf16.msra.mxu1 %v1493_v11  ;;  %s643_s28 = scalar_lea.vmem [#allocation2], %s1198_s27  ;;  %s1201_s30 = sshll.u32 %s1625_s29, 1 }
  0x1c   : > { %1276 = vmatprep.mubr.msk.bf16.mxu1 %vm1420_vm0, %v1419_v0  ;;  %1274 = vmatprep.subr.bf16.mxu1 %v1419_v0  ;;  %s726_s5 = scalar_lea.vmem [#allocation2], %s1201_s30 }
  0x1d   : > { %s1648_s6 = scalar_select %p382_p4, 5, 2 }
  0x1e   : > { %1267 = vmatpush3.bf16.msra.mxu0 %v1500_v12  ;;  %s1666_s9 = scalar_select %p382_p4, 6, 1 }
  0x1f   : > { %1280 = vmatprep.subr.bf16.mxu0 %v1419_v0  ;;  %1275 = vmatpush3.bf16.msra.mxu1 %v1500_v12  ;;  %s1204_s7 = sshll.u32 %s1648_s6, 1 }
  0x20   : > { %1288 = vmatprep.subr.bf16.mxu1 %v1419_v0  ;;  %s809_s8 = scalar_lea.vmem [#allocation2], %s1204_s7  ;;  %s1207_s10 = sshll.u32 %s1666_s9, 1 }
  0x21   : > { %1269 = vmatmul.mubr.bf16.vlgmr.msra.gmra.mrb[4].mxu0 %v1421_v13 }
  0x22   : > { %1281 = vmatpush3.bf16.msra.mxu0 %v1493_v11  ;;  %1284 = vmatprep.mubr.msk.bf16.mxu0 %vm1420_vm0, %v1419_v0 }
  0x23   : > { %1282 = vmatprep.subr.bf16.mxu0 %v1419_v0 }
  0x26   : > { %1283 = vmatpush3.bf16.msra.mxu0 %v1500_v12 }
  0x27   : > { %1296 = vmatprep.subr.bf16.mxu0 %v1419_v0 }
  0xec   : > { %v299_v14 = vpop.f32.mrb[0].mxu0  ;;  %v355_v15 = vpop.f32.mrb[0].mxu1 }
  0xed   : > { %v1254_v17 = vpop.f32.mrb[1].mxu0  ;;  %v356_v18 = vadd.f32 %v355_v15, %v299_v14  ;;  %v1262_v19 = vpop.f32.mrb[1].mxu1 }
  0xee   : > { %v302_v20 = vpop.f32.mrb[2].mxu0  ;;  %v358_v21 = vpop.f32.mrb[2].mxu1 }
  0xef   : > { %v1255_v22 = vpop.f32.mrb[3].mxu0  ;;  %v369_v23 = vadd.f32 %v1187_v16, %v356_v18  ;;  %v359_v24 = vadd.f32 %v358_v21, %v302_v20  ;;  %v1263_v25 = vpop.f32.mrb[3].mxu1 }
  0xf1   : > { %371 = vst [vmem:[#allocation2] sm:$0xff] %v369_v23  ;;  %v370_v26 = vadd.f32 %v1187_v16, %v359_v24 }
  0xf3   : > { %372 = vst [vmem:[#allocation2 + $0x8] sm:$0xff] %v370_v26 }
  0xf4   : > { %v436_v27 = vpop.f32.mrb[4].mxu0 }
  0xf5   : > { %v1270_v28 = vpop.f32.mrb[5].mxu0 }
  0xf6   : > { %v439_v29 = vpop.f32.mrb[6].mxu0 }
  0xf7   : > { %v1271_v30 = vpop.f32.mrb[7].mxu0 }
  0xfa   : > { %v386_v31 = vld [vmem:[%s385_s13] sm:$0x3]  ;;  %s892_s13 = scalar_lea.vmem [#allocation2], %s1207_s10 }
  0xfb   : > { %v442_v32 = vadd.f32 %v436_v27, %v386_v31  ;;  %v478_v52 = vld [vmem:[%s477_s21] sm:$0x3]  ;;  %s1680_s21 = scalar_select %p382_p4, 7, 0 }
  0xfc   : > { %v561_v13 = vld [vmem:[%s560_s25] sm:$0x3] }
  0xfd   : > { %v1191_v33 = vmul.f32 -1.442695, %v442_v32  ;;  %v644_v35 = vld [vmem:[%s643_s28] sm:$0x3]  ;;  %s1210_s25 = sshll.u32 %s1680_s21, 1 }
  0xfe   : > { %s975_s28 = scalar_lea.vmem [#allocation2], %s1210_s25 }
  0xff   : > { %1347 = vpow2.f32 %v1191_v33 }
 0x100   : > { %1349 = vtanh.f32 %v442_v32 }
 0x109   : > { %v1348_v34 = vpop.eup %1347 }
 0x10a   : > { %v447_v36 = vadd.f32 1.0, %v1348_v34  ;;  %v1350_v39 = vpop.eup %1349 }
 0x10c   : > { %1351 = vrcp.f32 %v447_v36 }
 0x116   : > { %v1352_v40 = vpop.eup %1351 }
 0x117   : > { %v450_v41 = vsel %vm1531_vm4, %v1350_v39, %v1352_v40 }
 0x118   : > { %453 = vrot.lane.b32.xlu0 %v450_v41, %s1422_s14  ;;  %v451_v44 = vmul.f32 0.0, %v450_v41 }
 0x18a   : > { %v454_v42 = vpop.permute.xlu0 %453 }
 0x18b   : > { %v456_v43 = vmul.f32 %v454_v42, %v450_v41 }
 0x18d   : > { %458 = vrot.lane.b32.xlu0 %v456_v43, %s1423_s18 }
 0x1ff   : > { %v459_v45 = vpop.permute.xlu0 %458 }
 0x200   : > { %v461_v46 = vadd.f32 %v459_v45, %v451_v44 }
 0x202   : > { %1353 = vtanh.f32 %v461_v46 }
 0x20c   : > { %v1354_v47 = vpop.eup %1353 }
 0x20d   : > { %464 = vrot.lane.b32.xlu1 %v1354_v47, %s1422_s14 }
 0x27f   : > { %v465_v48 = vpop.permute.xlu1 %464 }
 0x280   : > { %v1540_v49 = vmul.f32 %v465_v48, %v450_v41 }
 0x282   : > { %v479_v50 = vpack.c.bf16 %v1540_v49, %v1540_v49 }
 0x284   : > { %481 = vrot.lane.b32.xlu1 %v479_v50, %s1423_s18 }
 0x2f6   : > { %v482_v51 = vpop.permute.xlu1 %481 }
 0x2f7   : > { %1277 = vmatmul.mubr.msk.bf16.vlgmr.msra.gmra.mrb[4].mxu1 %vm261_vm1, %v482_v51 }
 0x2f8   : > { %1289 = vmatpush3.bf16.msra.mxu1 %v1493_v11  ;;  %1292 = vmatprep.mubr.msk.bf16.mxu1 %vm1420_vm0, %v1419_v0 }
 0x2f9   : > { %1290 = vmatprep.subr.bf16.mxu1 %v1419_v0 }
 0x2fc   : > { %1291 = vmatpush3.bf16.msra.mxu1 %v1500_v12 }
 0x2fd   : > { %1304 = vmatprep.subr.bf16.mxu1 %v1419_v0 }
 0x3ca   : > { %v520_v53 = vpop.f32.mrb[4].mxu1 }
 0x3cb   : > { %v526_v54 = vadd.f32 %v520_v53, %v478_v52  ;;  %v1278_v55 = vpop.f32.mrb[5].mxu1 }
 0x3cc   : > { %v523_v56 = vpop.f32.mrb[6].mxu1 }
 0x3cd   : > { %v1194_v57 = vmul.f32 -1.442695, %v526_v54  ;;  %v1279_v58 = vpop.f32.mrb[7].mxu1 }
 0x3cf   : > { %1355 = vpow2.f32 %v1194_v57 }
 0x3d0   : > { %1357 = vtanh.f32 %v526_v54 }
 0x3d9   : > { %v1356_v59 = vpop.eup %1355 }
 0x3da   : > { %v531_v60 = vadd.f32 1.0, %v1356_v59  ;;  %v1358_v61 = vpop.eup %1357  ;;  %v727_v59 = vld [vmem:[%s726_s5] sm:$0x3] }
 0x3dc   : > { %1359 = vrcp.f32 %v531_v60 }
 0x3e6   : > { %v1360_v62 = vpop.eup %1359 }
 0x3e7   : > { %v534_v63 = vsel %vm1531_vm4, %v1358_v61, %v1360_v62 }
 0x3e8   : > { %537 = vrot.lane.b32.xlu0 %v534_v63, %s1422_s14  ;;  %v535_v3 = vmul.f32 %v534_v63, %v461_v46 }
 0x45a   : > { %v538_v1 = vpop.permute.xlu0 %537 }
 0x45b   : > { %v540_v2 = vmul.f32 %v538_v1, %v534_v63 }
 0x45d   : > { %542 = vrot.lane.b32.xlu1 %v540_v2, %s1423_s18 }
 0x4cf   : > { %v543_v4 = vpop.permute.xlu1 %542 }
 0x4d0   : > { %v545_v5 = vadd.f32 %v543_v4, %v535_v3 }
 0x4d2   : > { %1361 = vtanh.f32 %v545_v5 }
 0x4dc   : > { %v1362_v6 = vpop.eup %1361 }
 0x4dd   : > { %548 = vrot.lane.b32.xlu0 %v1362_v6, %s1422_s14 }
 0x54f   : > { %v549_v7 = vpop.permute.xlu0 %548 }
 0x550   : > { %v1564_v8 = vmul.f32 %v549_v7, %v534_v63 }
 0x552   : > { %v562_v9 = vpack.c.bf16 %v1564_v8, %v1564_v8 }
 0x554   : > { %564 = vrot.lane.b32.xlu1 %v562_v9, %s1423_s18 }
 0x5c6   : > { %v565_v10 = vpop.permute.xlu1 %564 }
 0x5c7   : > { %1285 = vmatmul.mubr.msk.bf16.vlgmr.msra.gmra.mrb[8].mxu0 %vm261_vm1, %v565_v10 }
 0x5c8   : > { %1297 = vmatpush3.bf16.msra.mxu0 %v1493_v11  ;;  %1300 = vmatprep.mubr.msk.bf16.mxu0 %vm1420_vm0, %v1419_v0 }
 0x5c9   : > { %1298 = vmatprep.subr.bf16.mxu0 %v1419_v0 }
 0x5cc   : > { %1299 = vmatpush3.bf16.msra.mxu0 %v1500_v12 }
 0x5cd   : > { %1312 = vmatprep.subr.bf16.mxu0 %v1419_v0 }
 0x69a   : > { %v603_v14 = vpop.f32.mrb[8].mxu0 }
 0x69b   : > { %v609_v15 = vadd.f32 %v603_v14, %v561_v13  ;;  %v1286_v16 = vpop.f32.mrb[9].mxu0 }
 0x69c   : > { %v606_v17 = vpop.f32.mrb[10].mxu0 }
 0x69d   : > { %v1197_v18 = vmul.f32 -1.442695, %v609_v15  ;;  %v1287_v19 = vpop.f32.mrb[11].mxu0 }
 0x69f   : > { %1363 = vpow2.f32 %v1197_v18 }
 0x6a0   : > { %1365 = vtanh.f32 %v609_v15 }
 0x6a9   : > { %v1364_v20 = vpop.eup %1363 }
 0x6aa   : > { %v614_v21 = vadd.f32 1.0, %v1364_v20  ;;  %v1366_v22 = vpop.eup %1365 }
 0x6ac   : > { %1367 = vrcp.f32 %v614_v21  ;;  %v810_v21 = vld [vmem:[%s809_s8] sm:$0x3]  ;;  %s1701_s8 = scalar_lea.vmem %s1750_s4, %s1216_s22 }
 0x6ad   : > { %s556_s17 = scalar_lea.vmem %s1701_s8, %s1192_s20  ;;  %s639_s22 = scalar_lea.vmem %s1701_s8, %s1195_s24 }
 0x6ae   : > { %s722_s11 = scalar_lea.vmem %s1701_s8, %s1198_s27  ;;  %s1054_s19 = scalar_lea.vmem %s1701_s8, %s1210_s25 }
 0x6b6   : > { %v1368_v23 = vpop.eup %1367 }
 0x6b7   : > { %v617_v24 = vsel %vm1531_vm4, %v1366_v22, %v1368_v23 }
 0x6b8   : > { %620 = vrot.lane.b32.xlu0 %v617_v24, %s1422_s14  ;;  %v618_v27 = vmul.f32 %v617_v24, %v545_v5 }
 0x72a   : > { %v621_v25 = vpop.permute.xlu0 %620 }
 0x72b   : > { %v623_v26 = vmul.f32 %v621_v25, %v617_v24 }
 0x72d   : > { %625 = vrot.lane.b32.xlu1 %v623_v26, %s1423_s18 }
 0x79f   : > { %v626_v28 = vpop.permute.xlu1 %625 }
 0x7a0   : > { %v628_v29 = vadd.f32 %v626_v28, %v618_v27 }
 0x7a2   : > { %1369 = vtanh.f32 %v628_v29 }
 0x7ac   : > { %v1370_v30 = vpop.eup %1369 }
 0x7ad   : > { %631 = vrot.lane.b32.xlu0 %v1370_v30, %s1422_s14 }
 0x81f   : > { %v632_v31 = vpop.permute.xlu0 %631 }
 0x820   : > { %v1588_v32 = vmul.f32 %v632_v31, %v617_v24 }
 0x822   : > { %v645_v33 = vpack.c.bf16 %v1588_v32, %v1588_v32 }
 0x824   : > { %647 = vrot.lane.b32.xlu1 %v645_v33, %s1423_s18 }
 0x896   : > { %v648_v34 = vpop.permute.xlu1 %647 }
 0x897   : > { %1293 = vmatmul.mubr.msk.bf16.vlgmr.msra.gmra.mrb[8].mxu1 %vm261_vm1, %v648_v34 }
 0x898   : > { %1305 = vmatpush3.bf16.msra.mxu1 %v1493_v11  ;;  %1308 = vmatprep.mubr.msk.bf16.mxu1 %vm1420_vm0, %v1419_v0 }
 0x899   : > { %1306 = vmatprep.subr.bf16.mxu1 %v1419_v0 }
 0x89c   : > { %1307 = vmatpush3.bf16.msra.mxu1 %v1500_v12 }
 0x89d   : > { %1320 = vmatprep.subr.bf16.mxu1 %v1419_v0 }
 0x96a   : > { %v686_v36 = vpop.f32.mrb[8].mxu1 }
 0x96b   : > { %v692_v37 = vadd.f32 %v686_v36, %v644_v35  ;;  %v1294_v39 = vpop.f32.mrb[9].mxu1 }
 0x96c   : > { %v689_v40 = vpop.f32.mrb[10].mxu1 }
 0x96d   : > { %v1200_v41 = vmul.f32 -1.442695, %v692_v37  ;;  %v1295_v42 = vpop.f32.mrb[11].mxu1 }
 0x96e   : > { %v893_v42 = vld [vmem:[%s892_s13] sm:$0x3]  ;;  %s472_s13 = scalar_lea.vmem %s1701_s8, %s1188_s12  ;;  %s805_s12 = scalar_lea.vmem %s1701_s8, %s1201_s30 }
 0x96f   : > { %1371 = vpow2.f32 %v1200_v41 }
 0x970   : > { %1373 = vtanh.f32 %v692_v37 }
 0x979   : > { %v1372_v43 = vpop.eup %1371 }
 0x97a   : > { %v697_v44 = vadd.f32 1.0, %v1372_v43  ;;  %v1374_v45 = vpop.eup %1373 }
 0x97c   : > { %1375 = vrcp.f32 %v697_v44 }
 0x986   : > { %v1376_v46 = vpop.eup %1375 }
 0x987   : > { %v700_v47 = vsel %vm1531_vm4, %v1374_v45, %v1376_v46 }
 0x988   : > { %703 = vrot.lane.b32.xlu0 %v700_v47, %s1422_s14  ;;  %v701_v51 = vmul.f32 %v700_v47, %v628_v29 }
 0x9fa   : > { %v704_v48 = vpop.permute.xlu0 %703 }
 0x9fb   : > { %v706_v50 = vmul.f32 %v704_v48, %v700_v47 }
 0x9fd   : > { %708 = vrot.lane.b32.xlu1 %v706_v50, %s1423_s18 }
 0xa6f   : > { %v709_v52 = vpop.permute.xlu1 %708 }
 0xa70   : > { %v711_v53 = vadd.f32 %v709_v52, %v701_v51 }
 0xa72   : > { %1377 = vtanh.f32 %v711_v53 }
 0xa7c   : > { %v1378_v54 = vpop.eup %1377 }
 0xa7d   : > { %714 = vrot.lane.b32.xlu0 %v1378_v54, %s1422_s14 }
 0xaef   : > { %v715_v55 = vpop.permute.xlu0 %714 }
 0xaf0   : > { %v1612_v56 = vmul.f32 %v715_v55, %v700_v47 }
 0xaf2   : > { %v728_v57 = vpack.c.bf16 %v1612_v56, %v1612_v56 }
 0xaf4   : > { %730 = vrot.lane.b32.xlu1 %v728_v57, %s1423_s18 }
 0xb66   : > { %v731_v58 = vpop.permute.xlu1 %730 }
 0xb67   : > { %1301 = vmatmul.mubr.msk.bf16.vlgmr.msra.gmra.mrb[12].mxu0 %vm261_vm1, %v731_v58 }
 0xb68   : > { %1313 = vmatpush3.bf16.msra.mxu0 %v1493_v11  ;;  %1316 = vmatprep.mubr.msk.bf16.mxu0 %vm1420_vm0, %v1419_v0 }
 0xb69   : > { %1314 = vmatprep.subr.bf16.mxu0 %v1419_v0 }
 0xb6c   : > { %1315 = vmatpush3.bf16.msra.mxu0 %v1500_v12 }
 0xc3a   : > { %v769_v60 = vpop.f32.mrb[12].mxu0 }
 0xc3b   : > { %v775_v61 = vadd.f32 %v769_v60, %v727_v59  ;;  %v1302_v62 = vpop.f32.mrb[13].mxu0 }
 0xc3c   : > { %v772_v63 = vpop.f32.mrb[14].mxu0 }
 0xc3d   : > { %v1203_v1 = vmul.f32 -1.442695, %v775_v61  ;;  %v1303_v2 = vpop.f32.mrb[15].mxu0 }
 0xc3f   : > { %1379 = vpow2.f32 %v1203_v1 }
 0xc40   : > { %1381 = vtanh.f32 %v775_v61 }
 0xc49   : > { %v1380_v3 = vpop.eup %1379 }
 0xc4a   : > { %v780_v4 = vadd.f32 1.0, %v1380_v3  ;;  %v1382_v5 = vpop.eup %1381  ;;  %v976_v3 = vld [vmem:[%s975_s28] sm:$0x3] }
 0xc4c   : > { %1383 = vrcp.f32 %v780_v4 }
 0xc56   : > { %v1384_v6 = vpop.eup %1383 }
 0xc57   : > { %v783_v7 = vsel %vm1531_vm4, %v1382_v5, %v1384_v6 }
 0xc58   : > { %786 = vrot.lane.b32.xlu0 %v783_v7, %s1422_s14  ;;  %v784_v13 = vmul.f32 %v783_v7, %v711_v53 }
 0xcca   : > { %v787_v9 = vpop.permute.xlu0 %786 }
 0xccb   : > { %v789_v10 = vmul.f32 %v787_v9, %v783_v7 }
 0xccd   : > { %791 = vrot.lane.b32.xlu1 %v789_v10, %s1423_s18 }
 0xd3f   : > { %v792_v14 = vpop.permute.xlu1 %791 }
 0xd40   : > { %v794_v15 = vadd.f32 %v792_v14, %v784_v13 }
 0xd42   : > { %1385 = vtanh.f32 %v794_v15 }
 0xd4c   : > { %v1386_v16 = vpop.eup %1385 }
 0xd4d   : > { %797 = vrot.lane.b32.xlu0 %v1386_v16, %s1422_s14 }
 0xdbf   : > { %v798_v17 = vpop.permute.xlu0 %797 }
 0xdc0   : > { %v1635_v18 = vmul.f32 %v798_v17, %v783_v7 }
 0xdc2   : > { %v811_v19 = vpack.c.bf16 %v1635_v18, %v1635_v18 }
 0xdc4   : > { %813 = vrot.lane.b32.xlu1 %v811_v19, %s1423_s18 }
 0xe36   : > { %v814_v20 = vpop.permute.xlu1 %813 }
 0xe37   : > { %1309 = vmatmul.mubr.msk.bf16.vlgmr.msra.gmra.mrb[12].mxu1 %vm261_vm1, %v814_v20 }
 0xe38   : > { %1321 = vmatpush3.bf16.msra.mxu1 %v1493_v11  ;;  %1324 = vmatprep.mubr.msk.bf16.mxu1 %vm1420_vm0, %v1419_v0 }
 0xe39   : > { %1322 = vmatprep.subr.bf16.mxu1 %v1419_v0 }
 0xe3c   : > { %1323 = vmatpush3.bf16.msra.mxu1 %v1500_v12 }
 0xf0a   : > { %v852_v22 = vpop.f32.mrb[12].mxu1 }
 0xf0b   : > { %v858_v23 = vadd.f32 %v852_v22, %v810_v21  ;;  %v1310_v24 = vpop.f32.mrb[13].mxu1 }
 0xf0c   : > { %v855_v11 = vpop.f32.mrb[14].mxu1 }
 0xf0d   : > { %v1206_v25 = vmul.f32 -1.442695, %v858_v23  ;;  %v1311_v26 = vpop.f32.mrb[15].mxu1 }
 0xf0f   : > { %1387 = vpow2.f32 %v1206_v25 }
 0xf10   : > { %1389 = vtanh.f32 %v858_v23 }
 0xf19   : > { %v1388_v27 = vpop.eup %1387 }
 0xf1a   : > { %v863_v0 = vadd.f32 1.0, %v1388_v27  ;;  %v1390_v12 = vpop.eup %1389 }
 0xf1c   : > { %1391 = vrcp.f32 %v863_v0 }
 0xf26   : > { %v1392_v28 = vpop.eup %1391 }
 0xf27   : > { %v866_v29 = vsel %vm1531_vm4, %v1390_v12, %v1392_v28 }
 0xf28   : > { %869 = vrot.lane.b32.xlu0 %v866_v29, %s1422_s14  ;;  %v867_v33 = vmul.f32 %v866_v29, %v794_v15 }
 0xf9a   : > { %v870_v30 = vpop.permute.xlu0 %869 }
 0xf9b   : > { %v872_v31 = vmul.f32 %v870_v30, %v866_v29 }
 0xf9d   : > { %874 = vrot.lane.b32.xlu1 %v872_v31, %s1423_s18 }
0x100f   : > { %v875_v34 = vpop.permute.xlu1 %874 }
0x1010   : > { %v877_v35 = vadd.f32 %v875_v34, %v867_v33 }
0x1012   : > { %1393 = vtanh.f32 %v877_v35 }
0x101c   : > { %v1394_v36 = vpop.eup %1393 }
0x101d   : > { %880 = vrot.lane.b32.xlu0 %v1394_v36, %s1422_s14 }
0x108f   : > { %v881_v37 = vpop.permute.xlu0 %880 }
0x1090   : > { %v1658_v39 = vmul.f32 %v881_v37, %v866_v29 }
0x1092   : > { %v894_v40 = vpack.c.bf16 %v1658_v39, %v1658_v39 }
0x1094   : > { %896 = vrot.lane.b32.xlu1 %v894_v40, %s1423_s18 }
0x1106   : > { %v897_v41 = vpop.permute.xlu1 %896 }
0x1107   : > { %1317 = vmatmul.mubr.msk.bf16.vlgmr.msra.gmra.mrb[16].mxu0 %vm261_vm1, %v897_v41 }
0x11da   : > { %v935_v43 = vpop.f32.mrb[16].mxu0 }
0x11db   : > { %v941_v44 = vadd.f32 %v935_v43, %v893_v42  ;;  %v1318_v45 = vpop.f32.mrb[17].mxu0 }
0x11dc   : > { %v938_v46 = vpop.f32.mrb[18].mxu0 }
0x11dd   : > { %v1209_v47 = vmul.f32 -1.442695, %v941_v44  ;;  %v1319_v48 = vpop.f32.mrb[19].mxu0 }
0x11df   : > { %1395 = vpow2.f32 %v1209_v47 }
0x11e0   : > { %1397 = vtanh.f32 %v941_v44 }
0x11e9   : > { %v1396_v50 = vpop.eup %1395 }
0x11ea   : > { %v946_v51 = vadd.f32 1.0, %v1396_v50  ;;  %v1398_v52 = vpop.eup %1397 }
0x11ec   : > { %1399 = vrcp.f32 %v946_v51 }
0x11f6   : > { %v1400_v53 = vpop.eup %1399 }
0x11f7   : > { %v949_v54 = vsel %vm1531_vm4, %v1398_v52, %v1400_v53 }
0x11f8   : > { %952 = vrot.lane.b32.xlu0 %v949_v54, %s1422_s14  ;;  %v950_v58 = vmul.f32 %v949_v54, %v877_v35 }
0x126a   : > { %v953_v55 = vpop.permute.xlu0 %952 }
0x126b   : > { %v955_v57 = vmul.f32 %v953_v55, %v949_v54 }
0x126d   : > { %957 = vrot.lane.b32.xlu1 %v955_v57, %s1423_s18 }
0x12df   : > { %v958_v59 = vpop.permute.xlu1 %957 }
0x12e0   : > { %v960_v60 = vadd.f32 %v958_v59, %v950_v58 }
0x12e2   : > { %1401 = vtanh.f32 %v960_v60 }
0x12ec   : > { %v1402_v61 = vpop.eup %1401 }
0x12ed   : > { %963 = vrot.lane.b32.xlu0 %v1402_v61, %s1422_s14 }
0x135f   : > { %v964_v62 = vpop.permute.xlu0 %963 }
0x1360   : > { %v966_v63 = vmul.f32 %v964_v62, %v949_v54 }
0x1362   : > { %v977_v1 = vpack.c.bf16 %v966_v63, %v966_v63 }
0x1364   : > { %979 = vrot.lane.b32.xlu1 %v977_v1, %s1423_s18 }
0x13d6   : > { %v980_v2 = vpop.permute.xlu1 %979 }
0x13d7   : > { %1325 = vmatmul.mubr.msk.bf16.vlgmr.msra.gmra.mrb[16].mxu1 %vm261_vm1, %v980_v2 }
0x14aa   : > { %v1018_v4 = vpop.f32.mrb[16].mxu1 }
0x14ab   : > { %v1024_v5 = vadd.f32 %v1018_v4, %v976_v3  ;;  %v1326_v6 = vpop.f32.mrb[17].mxu1 }
0x14ac   : > { %v1021_v7 = vpop.f32.mrb[18].mxu1 }
0x14ad   : > { %v1212_v9 = vmul.f32 -1.442695, %v1024_v5  ;;  %v1327_v10 = vpop.f32.mrb[19].mxu1 }
0x14af   : > { %1403 = vpow2.f32 %v1212_v9 }
0x14b0   : > { %1405 = vtanh.f32 %v1024_v5 }
0x14b9   : > { %v1404_v13 = vpop.eup %1403 }
0x14ba   : > { %v1029_v14 = vadd.f32 1.0, %v1404_v13  ;;  %v1406_v15 = vpop.eup %1405 }
0x14bc   : > { %1407 = vrcp.f32 %v1029_v14 }
0x14c6   : > { %v1408_v16 = vpop.eup %1407 }
0x14c7   : > { %v1032_v17 = vsel %vm1531_vm4, %v1406_v15, %v1408_v16 }
0x14c8   : > { %1035 = vrot.lane.b32.xlu0 %v1032_v17, %s1422_s14  ;;  %v1033_v38 = vmul.f32 %v1032_v17, %v960_v60 }
0x153a   : > { %v1036_v19 = vpop.permute.xlu0 %1035 }
0x153b   : > { %v1038_v20 = vmul.f32 %v1036_v19, %v1032_v17 }
0x153d   : > { %1040 = vrot.lane.b32.xlu1 %v1038_v20, %s1423_s18 }
0x1541   : > { %469 = vrot.lane.b32.xlu1 %v1540_v49, %s1423_s18 }
0x1545   : > { %636 = vrot.lane.b32.xlu1 %v1588_v32, %s1423_s18 }
0x1549   : > { %802 = vrot.lane.b32.xlu1 %v1635_v18, %s1423_s18 }
0x154d   : > { %968 = vrot.lane.b32.xlu1 %v966_v63, %s1423_s18 }
0x15af   : > { %v1041_v21 = vpop.permute.xlu1 %1040 }
0x15b0   : > { %v1043_v49 = vadd.f32 %v1041_v21, %v1033_v38 }
0x15b2   : > { %1409 = vtanh.f32 %v1043_v49 }
0x15b3   : > { %v470_v32 = vpop.permute.xlu1 %469 }
0x15b4   : > { %474 = vst.msk [vmem:[%s472_s13] sm:$0x3] %vm473_vm5, %v470_v32 }
0x15b7   : > { %v637_v23 = vpop.permute.xlu1 %636 }
0x15bc   : > { %v1410_v18 = vpop.eup %1409 }
0x15bd   : > { %1046 = vrot.lane.b32.xlu0 %v1410_v18, %s1422_s14  ;;  %s888_s14 = scalar_lea.vmem %s1701_s8, %s1204_s7 }
0x15c1   : > { %553 = vrot.lane.b32.xlu0 %v1564_v8, %s1423_s18 }
0x15c5   : > { %719 = vrot.lane.b32.xlu0 %v1612_v56, %s1423_s18  ;;  %v803_v56 = vpop.permute.xlu1 %802 }
0x15c9   : > { %885 = vrot.lane.b32.xlu0 %v1658_v39, %s1423_s18  ;;  %v969_v26 = vpop.permute.xlu1 %968 }
0x162f   : > { %v1047_v22 = vpop.permute.xlu0 %1046 }
0x1630   : > { %v1049_v24 = vmul.f32 %v1047_v22, %v1032_v17 }
0x1632   : > { %1051 = vrot.lane.b32.xlu0 %v1049_v24, %s1423_s18  ;;  %s971_s18 = scalar_lea.vmem %s1701_s8, %s1207_s10 }
0x1633   : > { %v554_v8 = vpop.permute.xlu0 %553 }
0x1634   : > { %557 = vst.msk [vmem:[%s556_s17] sm:$0x3] %vm473_vm5, %v554_v8 }
0x1635   : > { %640 = vst.msk [vmem:[%s639_s22] sm:$0x3] %vm473_vm5, %v637_v23 }
0x1637   : > { %v720_v11 = vpop.permute.xlu0 %719 }
0x1638   : > { %723 = vst.msk [vmem:[%s722_s11] sm:$0x3] %vm473_vm5, %v720_v11 }
0x1639   : > { %806 = vst.msk [vmem:[%s805_s12] sm:$0x3] %vm473_vm5, %v803_v56 }
0x163b   : > { %v886_v25 = vpop.permute.xlu0 %885 }
0x163c   : > { %889 = vst.msk [vmem:[%s888_s14] sm:$0x3] %vm473_vm5, %v886_v25 }
0x163d   : > { %972 = vst.msk [vmem:[%s971_s18] sm:$0x3] %vm473_vm5, %v969_v26 }
0x16a4   : > { %v1052_v27 = vpop.permute.xlu0 %1051 }
0x16a5   : > { %1055 = vst.msk [vmem:[%s1054_s19] sm:$0x3] %vm473_vm5, %v1052_v27 }
0x16a6 PF: > { %s14_s15 = sadd.s32 1, %s1417_s15  }
0x16a7   : > { %p11_p5 = scmp.ge.s32.totalorder %s14_s15, 4  }
0x16a9   :  { %13 = sbr.rel (!%p11_p5) target bundleno = 1 (0x1), region = 90 }

</bundles_post_ra>
